<compile_context>
chip_gen: v7x
topology: tpu7x:2x2x1
jax: 0.10.0
libtpu: 0.0.40
codegen_flags: <defaults>
</compile_context>

<pallas_src>
import functools
import math

import jax
import jax.numpy as jnp
from jax import lax
from jax.experimental import pallas as pl
from jax.experimental.pallas import tpu as pltpu


# ---------------------------------------------------------------------------
# Configuration logic replicated from the PyTorch module
# ---------------------------------------------------------------------------
def validate_group_conv_sizes(in_ch, out_ch):
    return [i for i in range(1, in_ch + 1) if in_ch % i == 0 and out_ch % i == 0]


def get_groups(in_ch, out_ch):
    sizes = validate_group_conv_sizes(in_ch, out_ch)
    mean = sum(sizes) / len(sizes)
    idx = min(range(len(sizes)), key=lambda i: abs(sizes[i] - mean))
    return sizes[idx]


def eca_kernel_size(channels, b=1, gamma=2):
    k = int(abs(math.log2(channels) / gamma + b / gamma))
    return k if k % 2 else k + 1


N, IN_CH, EXP_CH, OUT_CH = 2, 8, 16, 16
H = W = 16
EXP_CONV_G = get_groups(IN_CH, EXP_CH)       # = 4   (expansion 1x1 conv groups, also CS groups)
JETCONV_PW_G = get_groups(EXP_CH, EXP_CH)    # = 8   (JetConv internal pointwise groups)
POINT_WISE_G = get_groups(EXP_CH, OUT_CH)    # = 8   (final pointwise groups)
ECA_KS = eca_kernel_size(EXP_CH)             # = 3
BN_EPS = 1e-5


# ---------------------------------------------------------------------------
# Pallas kernel: the entire JetBlock forward, whole batch fused on the lanes.
# Refs (all resident in VMEM, single grid=() invocation):
#   x:     (IN_CH,  NL)       input slab, NL = N*H*W
#   w1:    (EXP_CH, IN_CH)    expansion 1x1 weight with channel shuffle folded in
#   gamma: (EXP_CH, 1)        BN weight (shuffled)
#   beta:  (EXP_CH, 1)        BN bias   (shuffled)
#   dw:    (9, EXP_CH, 1)     depthwise 3x3 taps, tap k = i*3 + j
#   mask:  (4, 1, NL)         boundary masks [col>0, col<W-1, row>0, row<H-1]
#   w2:    (EXP_CH, EXP_CH)   JetConv pointwise (block-diagonal, groups=8)
#   weca:  (EXP_CH, EXP_CH)   ECA 1D conv as banded matrix
#   w3:    (OUT_CH, EXP_CH)   final pointwise (block-diagonal, groups=8)
#   pool:  (NL, N)            per-image averaging matrix (bcast^T / (H*W))
#   bcast: (N, NL)            per-image one-hot lane-broadcast matrix
#   o:     (OUT_CH, NL)       output slab
# ---------------------------------------------------------------------------
def jetblock_kernel(x_ref, w1_ref, gamma_ref, beta_ref, dw_ref, mask_ref,
                    w2_ref, weca_ref, w3_ref, pool_ref, bcast_ref, o_ref,
                    *, spatial_w):
    f32 = jnp.float32
    nl = x_ref.shape[1]

    # --- op 1: expansion 1x1 grouped conv (channel shuffle folded into w1) ---
    t = jnp.dot(w1_ref[...], x_ref[...], preferred_element_type=f32)   # (C, NL)
    c = t.shape[0]

    # --- op 2: BatchNorm2d, training-mode batch stats.  The two cross-lane
    # sums go to the MXU (one (2C, NL)x(NL, 1) matmul) instead of the XLU. ---
    ones_col = jnp.ones((nl, 1), f32)
    s12 = jnp.dot(jnp.concatenate([t, t * t], axis=0), ones_col,
                  preferred_element_type=f32)                           # (2C, 1)
    inv_cnt = 1.0 / nl
    mean = s12[:c] * inv_cnt
    var = s12[c:] * inv_cnt - mean * mean
    inv_std = lax.rsqrt(var + BN_EPS)
    scale = gamma_ref[...] * inv_std
    shift = beta_ref[...] - mean * scale
    y = t * scale + shift

    # --- op 3: REU ----------------------------------------------------------
    # TODO(synk): REU is referenced but never defined in the source module;
    # ReLU6 is used as a stand-in here (and below).
    y = jnp.clip(y, 0.0, 6.0)

    # --- op 4: CS channel shuffle: folded into w1/gamma/beta (no-op here) ----

    # --- op 5a: JetConv depthwise 3x3 (pad=1), separable 4-roll form --------
    # masks: 0: col>0 (dj=-1), 1: col<W-1 (dj=+1), 2: row>0 (di=-1), 3: row<H-1 (di=+1)
    mh_l = mask_ref[0]
    mh_r = mask_ref[1]
    mv_u = mask_ref[2]
    mv_d = mask_ref[3]

    h_m1 = mh_l * pltpu.roll(y, 1, 1)            # h_m1[:, l] = y[:, l-1] (masked)
    h_p1 = mh_r * pltpu.roll(y, nl - 1, 1)       # h_p1[:, l] = y[:, l+1] (masked)

    rows = []
    for i in range(3):                            # di = i - 1
        r = (dw_ref[3 * i] * h_m1
             + dw_ref[3 * i + 1] * y
             + dw_ref[3 * i + 2] * h_p1)
        rows.append(r)

    acc = rows[1]                                             # di = 0
    acc = acc + mv_u * pltpu.roll(rows[0], spatial_w, 1)      # di = -1
    acc = acc + mv_d * pltpu.roll(rows[2], nl - spatial_w, 1)  # di = +1

    # --- op 5b: JetConv pointwise 1x1 (block-diagonal matmul) ---------------
    y = jnp.dot(w2_ref[...], acc, preferred_element_type=f32)

    # --- op 6: ECA: per-image GAP (MXU) + banded channel conv + sigmoid gate -
    pooled = jnp.dot(y, pool_ref[...], preferred_element_type=f32)        # (C, N)
    att = jax.nn.sigmoid(
        jnp.dot(weca_ref[...], pooled, preferred_element_type=f32))       # (C, N)
    gate = jnp.dot(att, bcast_ref[...], preferred_element_type=f32)       # (C, NL)
    y = y * gate

    # --- op 7: REU ----------------------------------------------------------
    y = jnp.clip(y, 0.0, 6.0)

    # --- op 8: final pointwise 1x1 grouped conv ------------------------------
    o_ref[...] = jnp.dot(w3_ref[...], y, preferred_element_type=f32)


# ---------------------------------------------------------------------------
# Parameter construction (deterministic, synthetic)
# ---------------------------------------------------------------------------
def block_diag_weight(key, in_ch, out_ch, groups, scale):
    cin_g, cout_g = in_ch // groups, out_ch // groups
    blocks = scale * jax.random.normal(key, (groups, cout_g, cin_g), dtype=jnp.float32)
    dense = jnp.zeros((out_ch, in_ch), dtype=jnp.float32)
    for g in range(groups):
        dense = dense.at[g * cout_g:(g + 1) * cout_g,
                         g * cin_g:(g + 1) * cin_g].set(blocks[g])
    return dense


def shuffle_src_indices(channels, groups):
    # CS(g): output channel p reads input channel (p % g) * cpg + (p // g)
    cpg = channels // groups
    return jnp.array([(p % groups) * cpg + (p // groups) for p in range(channels)],
                     dtype=jnp.int32)


def eca_band_matrix(taps, channels):
    m = jnp.zeros((channels, channels), jnp.float32)
    half = (taps.shape[0] - 1) // 2
    for k in range(taps.shape[0]):
        off = k - half
        diag_len = channels - abs(off)
        rows = jnp.arange(max(0, -off), max(0, -off) + diag_len)
        cols = rows + off
        m = m.at[rows, cols].set(taps[k])
    return m


def build_params(key):
    ks = jax.random.split(key, 7)
    return dict(
        w1=block_diag_weight(ks[0], IN_CH, EXP_CH, EXP_CONV_G, scale=0.3),
        gamma=1.0 + 0.1 * jax.random.normal(ks[1], (EXP_CH,), dtype=jnp.float32),
        beta=0.1 * jax.random.normal(ks[2], (EXP_CH,), dtype=jnp.float32),
        dw=0.2 * jax.random.normal(ks[3], (EXP_CH, 3, 3), dtype=jnp.float32),
        w2=block_diag_weight(ks[4], EXP_CH, EXP_CH, JETCONV_PW_G, scale=0.3),
        weca=eca_band_matrix(
            0.5 * jax.random.normal(ks[5], (ECA_KS,), dtype=jnp.float32), EXP_CH),
        w3=block_diag_weight(ks[6], EXP_CH, OUT_CH, POINT_WISE_G, scale=0.3),
        cs_src=shuffle_src_indices(EXP_CH, EXP_CONV_G),
    )


# ---------------------------------------------------------------------------
# One-time host prepare: fold the channel shuffle, build tap / mask / pooling
# factors.  Done once; the per-call path below only reshapes + calls the kernel.
# ---------------------------------------------------------------------------
def prepare_inputs(params, n, h, w):
    l = h * w
    nl = n * l
    c_exp = params["w1"].shape[0]
    src = params["cs_src"]

    # Fold CS into the expansion weight / BN params (exact, via gather).
    w1p = params["w1"][src, :]
    gamma_p = params["gamma"][src].reshape(c_exp, 1)
    beta_p = params["beta"][src].reshape(c_exp, 1)

    # Depthwise taps: (9, C, 1), tap k = i*3 + j, post-shuffle channel order.
    dw9 = jnp.transpose(params["dw"].reshape(c_exp, 9), (1, 0))[:, :, None]

    # Boundary masks (rank-1 factors of the 3x3 validity pattern).
    col = jnp.tile(jnp.arange(l) % w, n)          # within-image column per lane
    row = jnp.tile(jnp.arange(l) // w, n)         # within-image row per lane
    masks = jnp.stack([
        (col >= 1).astype(jnp.float32),           # dj = -1
        (col <= w - 2).astype(jnp.float32),       # dj = +1
        (row >= 1).astype(jnp.float32),           # di = -1
        (row <= h - 2).astype(jnp.float32),       # di = +1
    ], axis=0)[:, None, :]                        # (4, 1, NL)

    # ECA per-image pooling / broadcast matrices (MXU-friendly).
    bcast = jnp.repeat(jnp.eye(n, dtype=jnp.float32), l, axis=1)   # (N, NL)
    pool = bcast.T * (1.0 / l)                                     # (NL, N)

    return dict(w1p=w1p, gamma_p=gamma_p, beta_p=beta_p, dw=dw9, masks=masks,
                w2=params["w2"], weca=params["weca"], w3=params["w3"],
                pool=pool, bcast=bcast)


# ---------------------------------------------------------------------------
# Jitted wrapper: NCHW <-> (C, N*H*W) reshapes + the single pallas_call.
# ---------------------------------------------------------------------------
@jax.jit
def jetblock_forward(x_nchw, prep):
    n, c_in, h, w = x_nchw.shape
    nl = n * h * w
    out_ch = prep["w3"].shape[0]

    # (N, C, H, W) -> (C, N*H*W): batch fused onto the lane axis.
    x2 = jnp.transpose(x_nchw, (1, 0, 2, 3)).reshape(c_in, nl).astype(jnp.float32)

    vmem = pl.BlockSpec(memory_space=pltpu.MemorySpace.VMEM)
    out2 = pl.pallas_call(
        functools.partial(jetblock_kernel, spatial_w=w),
        out_shape=jax.ShapeDtypeStruct((out_ch, nl), jnp.float32),
        in_specs=[vmem] * 11,
        out_specs=vmem,
    )(x2, prep["w1p"], prep["gamma_p"], prep["beta_p"], prep["dw"],
      prep["masks"], prep["w2"], prep["weca"], prep["w3"],
      prep["pool"], prep["bcast"])

    # (C_out, N*H*W) -> (N, C_out, H, W)
    return jnp.transpose(out2.reshape(out_ch, n, h, w), (1, 0, 2, 3))


# ---------------------------------------------------------------------------
# Pure-JAX reference (NCHW, unfused / unfolded), pinned to HIGHEST precision
# so it is an exact f32 baseline on TPU.
# ---------------------------------------------------------------------------
def jetblock_reference(x, params):
    hi = lax.Precision.HIGHEST

    def pw(wd, t):
        return jnp.einsum("oc,nchw->nohw", wd, t, precision=hi)

    c_exp = params["w1"].shape[0]
    y = pw(params["w1"], x)
    mean = jnp.mean(y, axis=(0, 2, 3), keepdims=True)
    var = jnp.var(y, axis=(0, 2, 3), keepdims=True)
    y = (y - mean) / jnp.sqrt(var + BN_EPS)
    y = y * params["gamma"].reshape(1, -1, 1, 1) + params["beta"].reshape(1, -1, 1, 1)
    y = jnp.clip(y, 0.0, 6.0)
    y = y[:, params["cs_src"], :, :]                       # CS channel shuffle
    y = lax.conv_general_dilated(
        y, params["dw"].reshape(c_exp, 1, 3, 3), (1, 1), ((1, 1), (1, 1)),
        feature_group_count=c_exp, dimension_numbers=("NCHW", "OIHW", "NCHW"),
        precision=hi)
    y = pw(params["w2"], y)
    pooled = jnp.mean(y, axis=(2, 3))
    att = jax.nn.sigmoid(jnp.einsum("oc,nc->no", params["weca"], pooled, precision=hi))
    y = y * att[:, :, None, None]
    y = jnp.clip(y, 0.0, 6.0)
    y = pw(params["w3"], y)
    return y


if __name__ == "__main__":
    key = jax.random.PRNGKey(0)
    k_x, k_p = jax.random.split(key)
    x = jax.random.normal(k_x, (N, IN_CH, H, W), dtype=jnp.float32)
    params = build_params(k_p)
    prep = prepare_inputs(params, N, H, W)     # one-time parameter precompute

    out = jax.block_until_ready(jetblock_forward(x, prep))
    ref = jax.block_until_ready(jetblock_reference(x, params))

    assert out.shape == (N, OUT_CH, H, W), out.shape
    err = float(jnp.max(jnp.abs(out - ref)))
    if err > 5e-3:
        raise AssertionError(f"kernel vs reference mismatch: max abs err {err}")
    print("KERNEL_OK")
</pallas_src>

<mosaic_0001>
module attributes {stable_mosaic.version = 11 : i64} {
  func.func @jetblock_kernel(%arg0: memref<8x512xf32, #tpu.memory_space<vmem>>, %arg1: memref<16x8xf32, #tpu.memory_space<vmem>>, %arg2: memref<16x1xf32, #tpu.memory_space<vmem>>, %arg3: memref<16x1xf32, #tpu.memory_space<vmem>>, %arg4: memref<9x16x1xf32, #tpu.memory_space<vmem>>, %arg5: memref<4x1x512xf32, #tpu.memory_space<vmem>>, %arg6: memref<16x16xf32, #tpu.memory_space<vmem>>, %arg7: memref<16x16xf32, #tpu.memory_space<vmem>>, %arg8: memref<16x16xf32, #tpu.memory_space<vmem>>, %arg9: memref<512x2xf32, #tpu.memory_space<vmem>>, %arg10: memref<2x512xf32, #tpu.memory_space<vmem>>, %arg11: memref<16x512xf32, #tpu.memory_space<vmem>>) attributes {dimension_semantics = [], scalar_prefetch = 0 : i64, scratch_operands = 0 : i64, tpu.core_type = #tpu.core_type<tc>} {
    %c0 = arith.constant 0 : index
    %c0_0 = arith.constant 0 : index
    %0 = vector.load %arg1[%c0, %c0_0] : memref<16x8xf32, #tpu.memory_space<vmem>>, vector<16x8xf32>
    %c0_1 = arith.constant 0 : index
    %c0_2 = arith.constant 0 : index
    %1 = vector.load %arg0[%c0_1, %c0_2] : memref<8x512xf32, #tpu.memory_space<vmem>>, vector<8x512xf32>
    %cst = arith.constant dense<0.000000e+00> : vector<16x512xf32>
    %2 = tpu.matmul %0, %1, %cst {dimension_numbers = #tpu.dot_dimension_numbers<[1], [0], [0], [1], [0, 0, 1, 1], [], []>} : vector<16x8xf32>, vector<8x512xf32>, vector<16x512xf32> -> vector<16x512xf32>
    %cst_3 = arith.constant 1.000000e+00 : f32
    %3 = vector.broadcast %cst_3 : f32 to vector<512x1xf32>
    %4 = arith.mulf %2, %2 : vector<16x512xf32>
    %5 = tpu.concatenate %2, %4 in 0 : vector<16x512xf32>, vector<16x512xf32> -> vector<32x512xf32>
    %cst_4 = arith.constant dense<0.000000e+00> : vector<32x1xf32>
    %6 = tpu.matmul %5, %3, %cst_4 {dimension_numbers = #tpu.dot_dimension_numbers<[1], [0], [0], [1], [0, 0, 1, 1], [], []>} : vector<32x512xf32>, vector<512x1xf32>, vector<32x1xf32> -> vector<32x1xf32>
    %7 = vector.extract_strided_slice %6 {offsets = [0, 0], sizes = [16, 1], strides = [1, 1]} : vector<32x1xf32> to vector<16x1xf32>
    %cst_5 = arith.constant 0.001953125 : f32
    %8 = vector.broadcast %cst_5 : f32 to vector<16x1xf32>
    %9 = arith.mulf %7, %8 : vector<16x1xf32>
    %10 = vector.extract_strided_slice %6 {offsets = [16, 0], sizes = [16, 1], strides = [1, 1]} : vector<32x1xf32> to vector<16x1xf32>
    %cst_6 = arith.constant 0.001953125 : f32
    %11 = vector.broadcast %cst_6 : f32 to vector<16x1xf32>
    %12 = arith.mulf %10, %11 : vector<16x1xf32>
    %13 = arith.mulf %9, %9 : vector<16x1xf32>
    %14 = arith.subf %12, %13 : vector<16x1xf32>
    %cst_7 = arith.constant 9.99999974E-6 : f32
    %15 = vector.broadcast %cst_7 : f32 to vector<16x1xf32>
    %16 = arith.addf %14, %15 : vector<16x1xf32>
    %17 = math.rsqrt %16 : vector<16x1xf32>
    %c0_8 = arith.constant 0 : index
    %c0_9 = arith.constant 0 : index
    %18 = vector.load %arg2[%c0_8, %c0_9] : memref<16x1xf32, #tpu.memory_space<vmem>>, vector<16x1xf32>
    %19 = arith.mulf %18, %17 : vector<16x1xf32>
    %c0_10 = arith.constant 0 : index
    %c0_11 = arith.constant 0 : index
    %20 = vector.load %arg3[%c0_10, %c0_11] : memref<16x1xf32, #tpu.memory_space<vmem>>, vector<16x1xf32>
    %21 = arith.mulf %9, %19 : vector<16x1xf32>
    %22 = arith.subf %20, %21 : vector<16x1xf32>
    %23 = vector.broadcast %19 : vector<16x1xf32> to vector<16x512xf32>
    %24 = arith.mulf %2, %23 : vector<16x512xf32>
    %25 = vector.broadcast %22 : vector<16x1xf32> to vector<16x512xf32>
    %26 = arith.addf %24, %25 : vector<16x512xf32>
    %cst_12 = arith.constant 0.000000e+00 : f32
    %cst_13 = arith.constant 6.000000e+00 : f32
    %27 = vector.broadcast %cst_12 : f32 to vector<16x512xf32>
    %28 = arith.maximumf %27, %26 : vector<16x512xf32>
    %29 = vector.broadcast %cst_13 : f32 to vector<16x512xf32>
    %30 = arith.minimumf %29, %28 : vector<16x512xf32>
    %c0_14 = arith.constant 0 : index
    %c0_15 = arith.constant 0 : index
    %c0_16 = arith.constant 0 : index
    %31 = vector.load %arg5[%c0_14, %c0_15, %c0_16] : memref<4x1x512xf32, #tpu.memory_space<vmem>>, vector<1x1x512xf32>
    %32 = vector.shape_cast %31 : vector<1x1x512xf32> to vector<1x512xf32>
    %c1 = arith.constant 1 : index
    %c0_17 = arith.constant 0 : index
    %c0_18 = arith.constant 0 : index
    %33 = vector.load %arg5[%c1, %c0_17, %c0_18] : memref<4x1x512xf32, #tpu.memory_space<vmem>>, vector<1x1x512xf32>
    %34 = vector.shape_cast %33 : vector<1x1x512xf32> to vector<1x512xf32>
    %c2 = arith.constant 2 : index
    %c0_19 = arith.constant 0 : index
    %c0_20 = arith.constant 0 : index
    %35 = vector.load %arg5[%c2, %c0_19, %c0_20] : memref<4x1x512xf32, #tpu.memory_space<vmem>>, vector<1x1x512xf32>
    %36 = vector.shape_cast %35 : vector<1x1x512xf32> to vector<1x512xf32>
    %c3 = arith.constant 3 : index
    %c0_21 = arith.constant 0 : index
    %c0_22 = arith.constant 0 : index
    %37 = vector.load %arg5[%c3, %c0_21, %c0_22] : memref<4x1x512xf32, #tpu.memory_space<vmem>>, vector<1x1x512xf32>
    %38 = vector.shape_cast %37 : vector<1x1x512xf32> to vector<1x512xf32>
    %c1_i32 = arith.constant 1 : i32
    %39 = tpu.dynamic_rotate %30 by %c1_i32 dim 1 : vector<16x512xf32>, i32 -> vector<16x512xf32>
    %40 = vector.broadcast %32 : vector<1x512xf32> to vector<16x512xf32>
    %41 = arith.mulf %40, %39 : vector<16x512xf32>
    %c511_i32 = arith.constant 511 : i32
    %42 = tpu.dynamic_rotate %30 by %c511_i32 dim 1 : vector<16x512xf32>, i32 -> vector<16x512xf32>
    %43 = vector.broadcast %34 : vector<1x512xf32> to vector<16x512xf32>
    %44 = arith.mulf %43, %42 : vector<16x512xf32>
    %c0_23 = arith.constant 0 : index
    %c0_24 = arith.constant 0 : index
    %c0_25 = arith.constant 0 : index
    %45 = vector.load %arg4[%c0_23, %c0_24, %c0_25] : memref<9x16x1xf32, #tpu.memory_space<vmem>>, vector<1x16x1xf32>
    %46 = vector.shape_cast %45 : vector<1x16x1xf32> to vector<16x1xf32>
    %47 = vector.broadcast %46 : vector<16x1xf32> to vector<16x512xf32>
    %48 = arith.mulf %47, %41 : vector<16x512xf32>
    %c1_26 = arith.constant 1 : index
    %c0_27 = arith.constant 0 : index
    %c0_28 = arith.constant 0 : index
    %49 = vector.load %arg4[%c1_26, %c0_27, %c0_28] : memref<9x16x1xf32, #tpu.memory_space<vmem>>, vector<1x16x1xf32>
    %50 = vector.shape_cast %49 : vector<1x16x1xf32> to vector<16x1xf32>
    %51 = vector.broadcast %50 : vector<16x1xf32> to vector<16x512xf32>
    %52 = arith.mulf %51, %30 : vector<16x512xf32>
    %53 = arith.addf %48, %52 : vector<16x512xf32>
    %c2_29 = arith.constant 2 : index
    %c0_30 = arith.constant 0 : index
    %c0_31 = arith.constant 0 : index
    %54 = vector.load %arg4[%c2_29, %c0_30, %c0_31] : memref<9x16x1xf32, #tpu.memory_space<vmem>>, vector<1x16x1xf32>
    %55 = vector.shape_cast %54 : vector<1x16x1xf32> to vector<16x1xf32>
    %56 = vector.broadcast %55 : vector<16x1xf32> to vector<16x512xf32>
    %57 = arith.mulf %56, %44 : vector<16x512xf32>
    %58 = arith.addf %53, %57 : vector<16x512xf32>
    %c3_32 = arith.constant 3 : index
    %c0_33 = arith.constant 0 : index
    %c0_34 = arith.constant 0 : index
    %59 = vector.load %arg4[%c3_32, %c0_33, %c0_34] : memref<9x16x1xf32, #tpu.memory_space<vmem>>, vector<1x16x1xf32>
    %60 = vector.shape_cast %59 : vector<1x16x1xf32> to vector<16x1xf32>
    %61 = vector.broadcast %60 : vector<16x1xf32> to vector<16x512xf32>
    %62 = arith.mulf %61, %41 : vector<16x512xf32>
    %c4 = arith.constant 4 : index
    %c0_35 = arith.constant 0 : index
    %c0_36 = arith.constant 0 : index
    %63 = vector.load %arg4[%c4, %c0_35, %c0_36] : memref<9x16x1xf32, #tpu.memory_space<vmem>>, vector<1x16x1xf32>
    %64 = vector.shape_cast %63 : vector<1x16x1xf32> to vector<16x1xf32>
    %65 = vector.broadcast %64 : vector<16x1xf32> to vector<16x512xf32>
    %66 = arith.mulf %65, %30 : vector<16x512xf32>
    %67 = arith.addf %62, %66 : vector<16x512xf32>
    %c5 = arith.constant 5 : index
    %c0_37 = arith.constant 0 : index
    %c0_38 = arith.constant 0 : index
    %68 = vector.load %arg4[%c5, %c0_37, %c0_38] : memref<9x16x1xf32, #tpu.memory_space<vmem>>, vector<1x16x1xf32>
    %69 = vector.shape_cast %68 : vector<1x16x1xf32> to vector<16x1xf32>
    %70 = vector.broadcast %69 : vector<16x1xf32> to vector<16x512xf32>
    %71 = arith.mulf %70, %44 : vector<16x512xf32>
    %72 = arith.addf %67, %71 : vector<16x512xf32>
    %c6 = arith.constant 6 : index
    %c0_39 = arith.constant 0 : index
    %c0_40 = arith.constant 0 : index
    %73 = vector.load %arg4[%c6, %c0_39, %c0_40] : memref<9x16x1xf32, #tpu.memory_space<vmem>>, vector<1x16x1xf32>
    %74 = vector.shape_cast %73 : vector<1x16x1xf32> to vector<16x1xf32>
    %75 = vector.broadcast %74 : vector<16x1xf32> to vector<16x512xf32>
    %76 = arith.mulf %75, %41 : vector<16x512xf32>
    %c7 = arith.constant 7 : index
    %c0_41 = arith.constant 0 : index
    %c0_42 = arith.constant 0 : index
    %77 = vector.load %arg4[%c7, %c0_41, %c0_42] : memref<9x16x1xf32, #tpu.memory_space<vmem>>, vector<1x16x1xf32>
    %78 = vector.shape_cast %77 : vector<1x16x1xf32> to vector<16x1xf32>
    %79 = vector.broadcast %78 : vector<16x1xf32> to vector<16x512xf32>
    %80 = arith.mulf %79, %30 : vector<16x512xf32>
    %81 = arith.addf %76, %80 : vector<16x512xf32>
    %c8 = arith.constant 8 : index
    %c0_43 = arith.constant 0 : index
    %c0_44 = arith.constant 0 : index
    %82 = vector.load %arg4[%c8, %c0_43, %c0_44] : memref<9x16x1xf32, #tpu.memory_space<vmem>>, vector<1x16x1xf32>
    %83 = vector.shape_cast %82 : vector<1x16x1xf32> to vector<16x1xf32>
    %84 = vector.broadcast %83 : vector<16x1xf32> to vector<16x512xf32>
    %85 = arith.mulf %84, %44 : vector<16x512xf32>
    %86 = arith.addf %81, %85 : vector<16x512xf32>
    %c16_i32 = arith.constant 16 : i32
    %87 = tpu.dynamic_rotate %58 by %c16_i32 dim 1 : vector<16x512xf32>, i32 -> vector<16x512xf32>
    %88 = vector.broadcast %36 : vector<1x512xf32> to vector<16x512xf32>
    %89 = arith.mulf %88, %87 : vector<16x512xf32>
    %90 = arith.addf %72, %89 : vector<16x512xf32>
    %c496_i32 = arith.constant 496 : i32
    %91 = tpu.dynamic_rotate %86 by %c496_i32 dim 1 : vector<16x512xf32>, i32 -> vector<16x512xf32>
    %92 = vector.broadcast %38 : vector<1x512xf32> to vector<16x512xf32>
    %93 = arith.mulf %92, %91 : vector<16x512xf32>
    %94 = arith.addf %90, %93 : vector<16x512xf32>
    %c0_45 = arith.constant 0 : index
    %c0_46 = arith.constant 0 : index
    %95 = vector.load %arg6[%c0_45, %c0_46] : memref<16x16xf32, #tpu.memory_space<vmem>>, vector<16x16xf32>
    %cst_47 = arith.constant dense<0.000000e+00> : vector<16x512xf32>
    %96 = tpu.matmul %95, %94, %cst_47 {dimension_numbers = #tpu.dot_dimension_numbers<[1], [0], [0], [1], [0, 0, 1, 1], [], []>} : vector<16x16xf32>, vector<16x512xf32>, vector<16x512xf32> -> vector<16x512xf32>
    %c0_48 = arith.constant 0 : index
    %c0_49 = arith.constant 0 : index
    %97 = vector.load %arg9[%c0_48, %c0_49] : memref<512x2xf32, #tpu.memory_space<vmem>>, vector<512x2xf32>
    %cst_50 = arith.constant dense<0.000000e+00> : vector<16x2xf32>
    %98 = tpu.matmul %96, %97, %cst_50 {dimension_numbers = #tpu.dot_dimension_numbers<[1], [0], [0], [1], [0, 0, 1, 1], [], []>} : vector<16x512xf32>, vector<512x2xf32>, vector<16x2xf32> -> vector<16x2xf32>
    %c0_51 = arith.constant 0 : index
    %c0_52 = arith.constant 0 : index
    %99 = vector.load %arg7[%c0_51, %c0_52] : memref<16x16xf32, #tpu.memory_space<vmem>>, vector<16x16xf32>
    %cst_53 = arith.constant dense<0.000000e+00> : vector<16x2xf32>
    %100 = tpu.matmul %99, %98, %cst_53 {dimension_numbers = #tpu.dot_dimension_numbers<[1], [0], [0], [1], [0, 0, 1, 1], [], []>} : vector<16x16xf32>, vector<16x2xf32>, vector<16x2xf32> -> vector<16x2xf32>
    %101 = arith.negf %100 : vector<16x2xf32>
    %102 = math.exp %101 : vector<16x2xf32>
    %cst_54 = arith.constant 1.000000e+00 : f32
    %103 = vector.broadcast %cst_54 : f32 to vector<16x2xf32>
    %104 = arith.addf %103, %102 : vector<16x2xf32>
    %105 = arith.divf %103, %104 : vector<16x2xf32>
    %c0_55 = arith.constant 0 : index
    %c0_56 = arith.constant 0 : index
    %106 = vector.load %arg10[%c0_55, %c0_56] : memref<2x512xf32, #tpu.memory_space<vmem>>, vector<2x512xf32>
    %cst_57 = arith.constant dense<0.000000e+00> : vector<16x512xf32>
    %107 = tpu.matmul %105, %106, %cst_57 {dimension_numbers = #tpu.dot_dimension_numbers<[1], [0], [0], [1], [0, 0, 1, 1], [], []>} : vector<16x2xf32>, vector<2x512xf32>, vector<16x512xf32> -> vector<16x512xf32>
    %108 = arith.mulf %96, %107 : vector<16x512xf32>
    %cst_58 = arith.constant 0.000000e+00 : f32
    %cst_59 = arith.constant 6.000000e+00 : f32
    %109 = vector.broadcast %cst_58 : f32 to vector<16x512xf32>
    %110 = arith.maximumf %109, %108 : vector<16x512xf32>
    %111 = vector.broadcast %cst_59 : f32 to vector<16x512xf32>
    %112 = arith.minimumf %111, %110 : vector<16x512xf32>
    %c0_60 = arith.constant 0 : index
    %c0_61 = arith.constant 0 : index
    %113 = vector.load %arg8[%c0_60, %c0_61] : memref<16x16xf32, #tpu.memory_space<vmem>>, vector<16x16xf32>
    %cst_62 = arith.constant dense<0.000000e+00> : vector<16x512xf32>
    %114 = tpu.matmul %113, %112, %cst_62 {dimension_numbers = #tpu.dot_dimension_numbers<[1], [0], [0], [1], [0, 0, 1, 1], [], []>} : vector<16x16xf32>, vector<16x512xf32>, vector<16x512xf32> -> vector<16x512xf32>
    %c0_63 = arith.constant 0 : index
    %c0_64 = arith.constant 0 : index
    %115 = vector.load %arg11[%c0_63, %c0_64] : memref<16x512xf32, #tpu.memory_space<vmem>>, vector<16x512xf32>
    tpu.vector_store %arg11[%c0_63, %c0_64], %114 {strides = array<i32>} : memref<16x512xf32, #tpu.memory_space<vmem>>, vector<16x512xf32>,
    return
  }
}

</mosaic_0001>

<bundles_post_ra>
// kernel: jetblock_forward.1
= control target key start
LH: loop header
LB: loop body
LE: loop exit
PB: predicated region body
PF: predicated region fallthrough
CT: control target
= control target key end

     0   :  { %v3016_v3 = vmov 0.0   ;;  %vm44_vm0 = vcmask 64512   ;;  %v2151_v7 = vmov 1.0|1.0   ;;  %v2152_v24 = vmov 0   ;;  %s2153_s17 = smov 1   ;;  %s3004_s0 = inlined_call_operand.vmem [shape: f32[8,512], index: 0, kind: input, shape index: {}]   ;;  %s3005_s1 = inlined_call_operand.vmem [shape: f32[16,8], index: 1, kind: input, shape index: {}]   ;;  %s3006_s2 = inlined_call_operand.vmem [shape: f32[16,1], index: 2, kind: input, shape index: {}]   ;;  %s3007_s3 = inlined_call_operand.vmem [shape: f32[16,1], index: 3, kind: input, shape index: {}]   ;;  %s3008_s4 = inlined_call_operand.vmem [shape: f32[9,16,1], index: 4, kind: input, shape index: {}]   ;;  %s3009_s5 = inlined_call_operand.vmem [shape: f32[4,1,512], index: 5, kind: input, shape index: {}]   ;;  %s3010_s9 = inlined_call_operand.vmem [shape: f32[512,2], index: 9, kind: input, shape index: {}]   ;;  %s3011_s6 = inlined_call_operand.vmem [shape: f32[16,16], index: 6, kind: input, shape index: {}]   ;;  %s3012_s7 = inlined_call_operand.vmem [shape: f32[16,16], index: 7, kind: input, shape index: {}]   ;;  %s3013_s10 = inlined_call_operand.vmem [shape: f32[2,512], index: 10, kind: input, shape index: {}]   ;;  %s3014_s8 = inlined_call_operand.vmem [shape: f32[16,16], index: 8, kind: input, shape index: {}]   ;;  %s3015_s11 = inlined_call_operand.vmem [shape: f32[16,512], index: 11, kind: output, shape index: {}]  }
   0x1   :  { %v41_v0 = vld [vmem:[%s3004_s0 + $0x8] sm:$0xff]  ;;  %v43_v1 = vld [vmem:[%s3004_s0 + $0x18] sm:$0xff]  ;;  %v40_v2 = vld [vmem:[%s3004_s0] sm:$0xff]  ;;  %115 = vmatprep.mubr.f32.mxu0 %v3016_v3  ;;  %192 = vmatprep.mubr.f32.mxu1 %v3016_v3  ;;  %s2155_s30 = smov 16   ;;  %s2156_s12 = smov 112   ;;  %vm936_vm5 = vcmask 130048  }
   0x2   :  { %51 = vmatprep.subr.mxu0 %v41_v0  ;;  %128 = vmatprep.subr.mxu1 %v43_v1  ;;  %v42_v4 = vld [vmem:[%s3004_s0 + $0x10] sm:$0xff]  ;;  %v38_v5 = vld [vmem:[%s3005_s1] sm:$0xff]  ;;  %v39_v6 = vld [vmem:[%s3005_s1 + $0x8] sm:$0xff]  ;;  %vm1432_vm6 = vcmask 1041408   ;;  %vm1425_vm7 = vcmask 15360  }
   0x3   :  { %52 = vmatpush1.msra.mxu0 %v40_v2  ;;  %129 = vmatpush1.msra.mxu1 %v42_v4  ;;  %v395_v63 = vld [vmem:[%s3006_s2] sm:$0xff]  ;;  %v396_v2 = vld [vmem:[%s3006_s2 + $0x8] sm:$0xff]  ;;  %s2154_s2 = smov 127  }
   0x4   :  { %1793 = vmatmul.mubr.msk.f32.vlgmr.msra.gmra.mrb[0].mxu0 %vm44_vm0, %v38_v5  ;;  %1795 = vmatmul.mubr.msk.f32.vlgmr.msra.gmra.mrb[0].mxu1 %vm44_vm0, %v38_v5  ;;  %v399_v4 = vld [vmem:[%s3007_s3] sm:$0xff] }
   0x5   :  { %121 = vmatprep.mubr.f32.mxu0 %v3016_v3  ;;  %198 = vmatprep.mubr.f32.mxu1 %v3016_v3 }
   0x6   :  { %2011 = vmatprep.subr.bf16.mxu0 %v2151_v7  ;;  %2027 = vmatprep.subr.bf16.mxu1 %v2151_v7 }
   0x7   :  { %2012 = vmatpush3.bf16.msra.mxu0 %v2151_v7  ;;  %2028 = vmatpush3.bf16.msra.mxu1 %v2151_v7 }
   0x8   :  { %1794 = vmatmul.mubr.msk.f32.gmra.mrb[2].mxu0 %vm44_vm0, %v39_v6  ;;  %1796 = vmatmul.mubr.msk.f32.gmra.mrb[2].mxu1 %vm44_vm0, %v39_v6 }
   0x9   :  { %2013 = vmatprep.subr.bf16.mxu0 %v2151_v7  ;;  %2029 = vmatprep.subr.bf16.mxu1 %v2151_v7 }
   0xa   :  { %2135 = vset.pattern.permute.xlu0 %v2152_v24  ;;  %2136 = vset.pattern.permute.xlu1 %v2152_v24  ;;  %v1801_v24 = vld [vmem:[%s3008_s4 + $0x18] sm:$0xff] }
   0xb   :  { %2014 = vmatpush3.bf16.msra.mxu0 %v2151_v7  ;;  %2030 = vmatpush3.bf16.msra.mxu1 %v2151_v7 }
   0xc   :  { %2015 = vmatprep.subr.bf16.mxu0 %v2151_v7  ;;  %2031 = vmatprep.subr.bf16.mxu1 %v2151_v7 }
   0xf   :  { %2016 = vmatpush3.bf16.msra.mxu0 %v2151_v7  ;;  %2032 = vmatpush3.bf16.msra.mxu1 %v2151_v7 }
  0x10   :  { %2017 = vmatprep.subr.bf16.mxu0 %v2151_v7  ;;  %2033 = vmatprep.subr.bf16.mxu1 %v2151_v7 }
  0x13   :  { %2018 = vmatpush3.bf16.msra.mxu0 %v2151_v7  ;;  %2034 = vmatpush3.bf16.msra.mxu1 %v2151_v7 }
  0x14   :  { %2019 = vmatprep.subr.bf16.mxu0 %v2151_v7  ;;  %2035 = vmatprep.subr.bf16.mxu1 %v2151_v7 }
  0x17   :  { %2020 = vmatpush3.bf16.msra.mxu0 %v2151_v7  ;;  %2036 = vmatpush3.bf16.msra.mxu1 %v2151_v7 }
  0x18   :  { %2021 = vmatprep.subr.bf16.mxu0 %v2151_v7  ;;  %2037 = vmatprep.subr.bf16.mxu1 %v2151_v7 }
  0x1b   :  { %2022 = vmatpush3.bf16.msra.mxu0 %v2151_v7  ;;  %2038 = vmatpush3.bf16.msra.mxu1 %v2151_v7 }
  0x1c   :  { %2023 = vmatprep.subr.bf16.mxu0 %v2151_v7  ;;  %2039 = vmatprep.subr.bf16.mxu1 %v2151_v7 }
  0x1f   :  { %2024 = vmatpush3.bf16.msra.mxu0 %v2151_v7  ;;  %2040 = vmatpush3.bf16.msra.mxu1 %v2151_v7 }
  0x20   :  { %2025 = vmatprep.subr.bf16.mxu0 %v2151_v7  ;;  %2041 = vmatprep.subr.bf16.mxu1 %v2151_v7 }
  0x23   :  { %2026 = vmatpush3.bf16.msra.mxu0 %v2151_v7  ;;  %2042 = vmatpush3.bf16.msra.mxu1 %v2151_v7 }
  0xd7   :  { %v2244_v8 = vpop.f32.mrb[0].mxu0  ;;  %v2246_v9 = vpop.f32.mrb[0].mxu1 }
  0xd8   :  { %v2248_v10 = vpop.f32.mrb[1].mxu0  ;;  %v2250_v11 = vpop.f32.mrb[1].mxu1  ;;  %v205_v18 = vmul.f32 %v2244_v8, %v2244_v8  ;;  %v207_v19 = vmul.f32 %v2246_v9, %v2246_v9 }
  0xd9   :  { %277 = vmatprep.mubr.f32.mxu0 %v2248_v10  ;;  %362 = vmatprep.mubr.f32.mxu1 %v2250_v11  ;;  %v206_v16 = vmul.f32 %v2248_v10, %v2248_v10  ;;  %v208_v17 = vmul.f32 %v2250_v11, %v2250_v11 }
  0xda   :  { %278 = vmatmul.mubr.f32.vlgmr.msra.gmra.mrb[4].mxu0 %v2244_v8  ;;  %363 = vmatmul.mubr.f32.vlgmr.msra.gmra.mrb[4].mxu1 %v2246_v9 }
  0xdb   :  { %v2256_v12 = vpop.f32.mrb[2].mxu0  ;;  %v2258_v13 = vpop.f32.mrb[2].mxu1 }
  0xdc   :  { %v2260_v14 = vpop.f32.mrb[3].mxu0  ;;  %v2262_v15 = vpop.f32.mrb[3].mxu1  ;;  %v209_v22 = vmul.f32 %v2256_v12, %v2256_v12  ;;  %v211_v23 = vmul.f32 %v2258_v13, %v2258_v13 }
  0xdd   :  { %282 = vmatprep.mubr.f32.mxu0 %v2260_v14  ;;  %367 = vmatprep.mubr.f32.mxu1 %v2262_v15  ;;  %v210_v20 = vmul.f32 %v2260_v14, %v2260_v14  ;;  %v212_v21 = vmul.f32 %v2262_v15, %v2262_v15 }
  0xde   :  { %283 = vmatmul.mubr.f32.gmra.mrb[6].mxu0 %v2256_v12  ;;  %368 = vmatmul.mubr.f32.gmra.mrb[6].mxu1 %v2258_v13 }
  0xdf   :  { %287 = vmatprep.mubr.f32.mxu0 %v206_v16  ;;  %372 = vmatprep.mubr.f32.mxu1 %v208_v17  ;;  %v400_v17 = vld [vmem:[%s3007_s3 + $0x8] sm:$0xff] }
  0xe2   :  { %288 = vmatmul.mubr.f32.gmra.mrb[8].mxu0 %v205_v18  ;;  %373 = vmatmul.mubr.f32.gmra.mrb[8].mxu1 %v207_v19  ;;  %v574_v19 = vld [vmem:[%s3008_s4] sm:$0xff] }
  0xe3   :  { %292 = vmatprep.mubr.f32.mxu0 %v210_v20  ;;  %377 = vmatprep.mubr.f32.mxu1 %v212_v21  ;;  %v1800_v21 = vld [vmem:[%s3008_s4 + $0x10] sm:$0xff] }
  0xe6   :  { %293 = vmatmul.mubr.f32.gmra.mrb[10].mxu0 %v209_v22  ;;  %378 = vmatmul.mubr.f32.gmra.mrb[10].mxu1 %v211_v23  ;;  %v575_v22 = vld [vmem:[%s3008_s4 + $0x8] sm:$0xff]  ;;  %v1802_v23 = vld [vmem:[%s3008_s4 + $0x20] sm:$0xff] }
  0xe7   :  { %1007 = vmatprep.mubr.f32.mxu0 %v3016_v3  ;;  %1084 = vmatprep.mubr.f32.mxu1 %v3016_v3 }
 0x1ad   :  { %v1868_v25 = vpop.f32.mrb[4].mxu0  ;;  %v1912_v26 = vpop.f32.mrb[4].mxu1 }
 0x1ae   :  { %v1869_v27 = vpop.f32.mrb[5].mxu0  ;;  %v1913_v28 = vpop.f32.mrb[5].mxu1 }
 0x1af   :  { %v1870_v29 = vadd.f32 %v1869_v27, %v1868_v25  ;;  %v1914_v30 = vadd.f32 %v1913_v28, %v1912_v26  ;;  %v1810_v25 = vld [vmem:[%s3008_s4 + $0x60] sm:$0xff]  ;;  %v1803_v26 = vld [vmem:[%s3008_s4 + $0x28] sm:$0xff]  ;;  %v1812_v27 = vld [vmem:[%s3008_s4 + $0x70] sm:$0xff] }
 0x1b0   :  { %v1811_v28 = vld [vmem:[%s3008_s4 + $0x68] sm:$0xff] }
 0x1b1   :  { %v365_v31 = vadd.f32 %v1914_v30, %v1870_v29  ;;  %v1871_v32 = vpop.f32.mrb[6].mxu0  ;;  %v1915_v33 = vpop.f32.mrb[6].mxu1  ;;  %v1814_v29 = vld [vmem:[%s3008_s4 + $0x80] sm:$0xff]  ;;  %v1813_v30 = vld [vmem:[%s3008_s4 + $0x78] sm:$0xff] }
 0x1b2   :  { %v1872_v34 = vpop.f32.mrb[7].mxu0  ;;  %v1916_v35 = vpop.f32.mrb[7].mxu1 }
 0x1b3   :  { %v1873_v36 = vadd.f32 %v1872_v34, %v1871_v32  ;;  %v1917_v37 = vadd.f32 %v1916_v35, %v1915_v33  ;;  %v383_v41 = vmul.f32 0.001953125, %v365_v31  ;;  %v1815_v31 = vld [vmem:[%s3008_s4 + $0x88] sm:$0xff] }
 0x1b5   :  { %v370_v38 = vadd.f32 %v1917_v37, %v1873_v36  ;;  %v1874_v39 = vpop.f32.mrb[8].mxu0  ;;  %v1918_v40 = vpop.f32.mrb[8].mxu1  ;;  %v387_v49 = vmul.f32 %v383_v41, %v383_v41 }
 0x1b6   :  { %v1875_v42 = vpop.f32.mrb[9].mxu0  ;;  %v1919_v43 = vpop.f32.mrb[9].mxu1 }
 0x1b7   :  { %v1876_v44 = vadd.f32 %v1875_v42, %v1874_v39  ;;  %v1920_v45 = vadd.f32 %v1919_v43, %v1918_v40  ;;  %v384_v52 = vmul.f32 0.001953125, %v370_v38 }
 0x1b9   :  { %v375_v46 = vadd.f32 %v1920_v45, %v1876_v44  ;;  %v1877_v47 = vpop.f32.mrb[10].mxu0  ;;  %v1921_v48 = vpop.f32.mrb[10].mxu1  ;;  %v388_v58 = vmul.f32 %v384_v52, %v384_v52 }
 0x1ba   :  { %v1878_v50 = vpop.f32.mrb[11].mxu0  ;;  %v1922_v51 = vpop.f32.mrb[11].mxu1 }
 0x1bb   :  { %v385_v53 = vmul.f32 0.001953125, %v375_v46  ;;  %v1879_v54 = vadd.f32 %v1878_v50, %v1877_v47  ;;  %v1923_v55 = vadd.f32 %v1922_v51, %v1921_v48 }
 0x1bd   :  { %v389_v56 = vsub.f32 %v385_v53, %v387_v49  ;;  %v380_v57 = vadd.f32 %v1923_v55, %v1879_v54 }
 0x1bf   :  { %v391_v59 = vadd.f32 1e-05, %v389_v56  ;;  %v386_v60 = vmul.f32 0.001953125, %v380_v57 }
 0x1c1   :  { %2138 = vrsqrt.f32 %v391_v59  ;;  %v390_v61 = vsub.f32 %v386_v60, %v388_v58  ;;  %v1804_v60 = vld [vmem:[%s3008_s4 + $0x30] sm:$0xff] }
 0x1c3   :  { %v392_v62 = vadd.f32 1e-05, %v390_v61  ;;  %v1806_v61 = vld [vmem:[%s3008_s4 + $0x40] sm:$0xff] }
 0x1c5   :  { %2140 = vrsqrt.f32 %v392_v62  ;;  %v1805_v62 = vld [vmem:[%s3008_s4 + $0x38] sm:$0xff] }
 0x1cb   :  { %v2139_v0 = vpop.eup %2138 }
 0x1cc   :  { %v397_v1 = vmul.f32 %v2139_v0, %v395_v63  ;;  %v1808_v63 = vld [vmem:[%s3008_s4 + $0x50] sm:$0xff]  ;;  %v1807_v0 = vld [vmem:[%s3008_s4 + $0x48] sm:$0xff] }
 0x1ce   :  { %407 = vperm.xlu0 %2135, %v397_v1   ;;  %v401_v5 = vmul.f32 %v397_v1, %v383_v41  ;;  %v1809_v1 = vld [vmem:[%s3008_s4 + $0x58] sm:$0xff] }
 0x1cf   :  { %v2141_v6 = vpop.eup %2140 }
 0x1d0   :  { %v403_v7 = vsub.f32 %v399_v4, %v401_v5  ;;  %v398_v16 = vmul.f32 %v2141_v6, %v396_v2 }
 0x1d2   :  { %425 = vperm.xlu1 %2136, %v403_v7   ;;  %412 = vperm.xlu0 %2135, %v398_v16   ;;  %v402_v18 = vmul.f32 %v398_v16, %v384_v52 }
 0x1d4   :  { %v404_v20 = vsub.f32 %v400_v17, %v402_v18 }
 0x1d6   :  { %578 = vperm.xlu0 %2135, %v574_v19   ;;  %430 = vperm.xlu1 %2136, %v404_v20  }
 0x1da   :  { %599 = vperm.xlu0 %2135, %v1800_v21   ;;  %583 = vperm.xlu1 %2136, %v575_v22  }
 0x1de   :  { %628 = vperm.xlu0 %2135, %v1802_v23   ;;  %604 = vperm.xlu1 %2136, %v1801_v24   ;;  %v480_v24 = vlaneseq }
 0x1e2   :  { %736 = vperm.xlu0 %2135, %v1810_v25   ;;  %633 = vperm.xlu1 %2136, %v1803_v26  }
 0x1e6   :  { %757 = vperm.xlu0 %2135, %v1812_v27   ;;  %741 = vperm.xlu1 %2136, %v1811_v28   ;;  %v2416_v27 = vshrl.u32 %v480_v24, 7 }
 0x1e8   :  { %3021 = vst [vmem:[#allocation2_spill] sm:$0xff] %v2416_v27 }
 0x1ea   :  { %786 = vperm.xlu0 %2135, %v1814_v29   ;;  %762 = vperm.xlu1 %2136, %v1813_v30   ;;  %v2418_v29 = vand.u32 127, %v480_v24 }
 0x1ec   :  { %vm482_vm1 = vcmp.lt.s32.totalorder %v2418_v29, 1  ;;  %vm536_vm2 = vcmp.lt.s32.totalorder %v2418_v29, 127  ;;  %vm826_vm3 = vcmp.lt.s32.totalorder %v2418_v29, 16  ;;  %vm888_vm4 = vcmp.lt.s32.totalorder %v2418_v29, 112  ;;  %v1098_v29 = vld [vmem:[%s3010_s9 + $0x8] sm:$0xff] }
 0x1ee   :  { %791 = vperm.xlu1 %2136, %v1815_v31   ;;  %v2421_v31 = vsub.s32 0, %v2416_v27 }
 0x24d   :  { %v408_v32 = vpop.permute.xlu0 %407 }
 0x24e   :  { %v415_v33 = vmul.f32 %v408_v32, %v2244_v8  ;;  %v416_v34 = vmul.f32 %v408_v32, %v2248_v10  ;;  %v417_v39 = vmul.f32 %v408_v32, %v2246_v9  ;;  %v418_v10 = vmul.f32 %v408_v32, %v2250_v11 }
 0x24f   :  { %v2424_v32 = vsub.s32 1, %v2416_v27 }
 0x251   :  { %v426_v35 = vpop.permute.xlu1 %425  ;;  %v413_v38 = vpop.permute.xlu0 %412 }
 0x252   :  { %v433_v36 = vadd.f32 %v426_v35, %v415_v33  ;;  %v434_v37 = vadd.f32 %v426_v35, %v416_v34  ;;  %v419_v41 = vmul.f32 %v413_v38, %v2256_v12  ;;  %v420_v42 = vmul.f32 %v413_v38, %v2260_v14  ;;  %v457_v33 = vld [vmem:[%s3009_s5] sm:$0xf] }
 0x253   :  { %v435_v44 = vadd.f32 %v426_v35, %v417_v39  ;;  %v421_v48 = vmul.f32 %v413_v38, %v2258_v13  ;;  %v436_v49 = vadd.f32 %v426_v35, %v418_v10  ;;  %v422_v53 = vmul.f32 %v413_v38, %v2262_v15 }
 0x254   :  { %v441_v40 = vmax.f32 %v433_v36, 0.0  ;;  %v442_v45 = vmax.f32 %v434_v37, 0.0  ;;  %v495_v35 = vrot.slane %v457_v33, %v2421_v31  ;;  %v499_v38 = vrot.slane %v457_v33, %v2424_v32 }
 0x255   :  { %v431_v43 = vpop.permute.xlu1 %430  ;;  %v443_v50 = vmax.f32 %v435_v44, 0.0  ;;  %v444_v11 = vmax.f32 %v436_v49, 0.0  ;;  %v2392_v2 = vpop.permute.xlu0 %578  ;;  %v2435_v39 = vsub.s32 2, %v2416_v27 }
 0x256   :  { %v2339_v46 = vmin.f32 %v441_v40, 6.0  ;;  %v437_v47 = vadd.f32 %v431_v43, %v419_v41  ;;  %v438_v8 = vadd.f32 %v431_v43, %v420_v42  ;;  %v2344_v12 = vmin.f32 %v442_v45, 6.0 }
 0x257   :  { %v439_v14 = vadd.f32 %v431_v43, %v421_v48  ;;  %v2351_v54 = vmin.f32 %v443_v50, 6.0  ;;  %v440_v55 = vadd.f32 %v431_v43, %v422_v53  ;;  %v2357_v57 = vmin.f32 %v444_v11, 6.0  ;;  %3022 = vst [vmem:[#allocation3_spill] sm:$0xff] %v2435_v39  ;;  %v1797_v43 = vld [vmem:[%s3009_s5 + $0x4] sm:$0xf] }
 0x258   :  { %464 = vrot.lane.b32.xlu0 %v2339_v46, %s2153_s17  ;;  %v445_v9 = vmax.f32 %v437_v47, 0.0  ;;  %v446_v51 = vmax.f32 %v438_v8, 0.0  ;;  %v2440_v41 = vsub.s32 3, %v2416_v27  ;;  %v503_v10 = vrot.slane %v457_v33, %v2435_v39 }
 0x259   :  { %v447_v13 = vmax.f32 %v439_v14, 0.0  ;;  %v448_v58 = vmax.f32 %v440_v55, 0.0  ;;  %v2394_v4 = vpop.permute.xlu1 %583  ;;  %v2396_v5 = vpop.permute.xlu0 %599  ;;  %v549_v48 = vrot.slane %v1797_v43, %v2421_v31 }
 0x25a   :  { %v2346_v52 = vmin.f32 %v445_v9, 6.0  ;;  %v2353_v56 = vmin.f32 %v446_v51, 6.0  ;;  %v507_v49 = vrot.slane %v457_v33, %v2440_v41  ;;  %v607_v14 = vmul.f32 %v2396_v5, %v2339_v46 }
 0x25b   :  { %v2359_v59 = vmin.f32 %v447_v13, 6.0  ;;  %v2363_v15 = vmin.f32 %v448_v58, 6.0  ;;  %v608_v13 = vmul.f32 %v2396_v5, %v2344_v12  ;;  %v609_v58 = vmul.f32 %v2396_v5, %v2351_v54 }
 0x25c   :  { %468 = vrot.lane.b32.xlu0 %v2344_v12, %s2153_s17  ;;  %466 = vrot.lane.b32.xlu1 %v2346_v52, %s2153_s17 }
 0x25d   :  { %v2398_v6 = vpop.permute.xlu1 %604  ;;  %v2400_v7 = vpop.permute.xlu0 %628 }
 0x260   :  { %472 = vrot.lane.b32.xlu0 %v2351_v54, %s2153_s17  ;;  %470 = vrot.lane.b32.xlu1 %v2353_v56, %s2153_s17 }
 0x261   :  { %v2402_v16 = vpop.permute.xlu1 %633  ;;  %v2404_v17 = vpop.permute.xlu0 %736 }
 0x264   :  { %476 = vrot.lane.b32.xlu0 %v2357_v57, %s2153_s17  ;;  %474 = vrot.lane.b32.xlu1 %v2359_v59, %s2153_s17 }
 0x265   :  { %v2406_v18 = vpop.permute.xlu1 %741  ;;  %v2408_v19 = vpop.permute.xlu0 %757 }
 0x268   :  { %520 = vrot.lane.b32.xlu0 %v2339_v46, %s2154_s2  ;;  %478 = vrot.lane.b32.xlu1 %v2363_v15, %s2153_s17 }
 0x269   :  { %v2410_v20 = vpop.permute.xlu1 %762  ;;  %v2412_v21 = vpop.permute.xlu0 %786 }
 0x26c   :  { %524 = vrot.lane.b32.xlu0 %v2344_v12, %s2154_s2  ;;  %522 = vrot.lane.b32.xlu1 %v2346_v52, %s2154_s2 }
 0x26d   :  { %v2414_v23 = vpop.permute.xlu1 %791 }
 0x270   :  { %528 = vrot.lane.b32.xlu0 %v2351_v54, %s2154_s2  ;;  %526 = vrot.lane.b32.xlu1 %v2353_v56, %s2154_s2 }
 0x274   :  { %532 = vrot.lane.b32.xlu0 %v2357_v57, %s2154_s2  ;;  %530 = vrot.lane.b32.xlu1 %v2359_v59, %s2154_s2 }
 0x278   :  { %657 = vperm.xlu0 %2135, %v1804_v60   ;;  %534 = vrot.lane.b32.xlu1 %v2363_v15, %s2154_s2 }
 0x27c   :  { %678 = vperm.xlu0 %2135, %v1806_v61   ;;  %662 = vperm.xlu1 %2136, %v1805_v62   ;;  %v553_v61 = vrot.slane %v1797_v43, %v2424_v32  ;;  %v611_v62 = vmul.f32 %v2398_v6, %v2346_v52 }
 0x280   :  { %707 = vperm.xlu0 %2135, %v1808_v63   ;;  %683 = vperm.xlu1 %2136, %v1807_v0  }
 0x284   :  { %712 = vperm.xlu1 %2136, %v1809_v1  }
 0x2ca   :  { %v465_v22 = vpop.permute.xlu0 %464 }
 0x2ce   :  { %v469_v25 = vpop.permute.xlu0 %468  ;;  %v467_v26 = vpop.permute.xlu1 %466 }
 0x2cf   :  { %v487_v40 = vsel %vm482_vm1, %v465_v22, %v469_v25 }
 0x2d0   :  { %v2449_v8 = vmul.f32 %v499_v38, %v487_v40 }
 0x2d2   :  { %v473_v28 = vpop.permute.xlu0 %472  ;;  %v471_v30 = vpop.permute.xlu1 %470  ;;  %v587_v63 = vmul.f32 %v2392_v2, %v2449_v8 }
 0x2d3   :  { %v485_v9 = vsel %vm482_vm1, %v469_v25, %v473_v28  ;;  %v488_v51 = vsel %vm482_vm1, %v467_v26, %v471_v30 }
 0x2d4   :  { %v2476_v0 = vmul.f32 %v503_v10, %v485_v9  ;;  %v2482_v24 = vmul.f32 %v499_v38, %v488_v51  ;;  %v616_v3 = vadd.f32 %v608_v13, %v587_v63 }
 0x2d6   :  { %v477_v34 = vpop.permute.xlu0 %476  ;;  %v475_v36 = vpop.permute.xlu1 %474  ;;  %v588_v51 = vmul.f32 %v2392_v2, %v2476_v0 }
 0x2d7   :  { %v489_v37 = vsel %vm482_vm1, %v477_v34, %v465_v22  ;;  %v612_v22 = vmul.f32 %v2398_v6, %v2353_v56  ;;  %v483_v25 = vsel %vm482_vm1, %v473_v28, %v477_v34  ;;  %v557_v34 = vrot.slane %v1797_v43, %v2435_v39 }
 0x2d8   :  { %v2445_v44 = vmul.f32 %v495_v35, %v489_v37 }
 0x2da   :  { %v521_v42 = vpop.permute.xlu0 %520  ;;  %v479_v45 = vpop.permute.xlu1 %478  ;;  %v586_v53 = vmul.f32 %v2392_v2, %v2445_v44 }
 0x2db   :  { %v490_v47 = vsel %vm482_vm1, %v479_v45, %v467_v26  ;;  %v486_v26 = vsel %vm482_vm1, %v471_v30, %v475_v36  ;;  %v561_v30 = vrot.slane %v1797_v43, %v2440_v41 }
 0x2dc   :  { %v2463_v11 = vmul.f32 %v495_v35, %v490_v47  ;;  %v615_v47 = vadd.f32 %v607_v14, %v586_v53  ;;  %v591_v14 = vmul.f32 %v2394_v4, %v2482_v24  ;;  %v2506_v53 = vmul.f32 %v507_v49, %v483_v25 }
 0x2de   :  { %v525_v50 = vpop.permute.xlu0 %524  ;;  %v523_v55 = vpop.permute.xlu1 %522  ;;  %v590_v35 = vmul.f32 %v2394_v4, %v2463_v11 }
 0x2df   :  { %v541_v60 = vsel %vm536_vm2, %v521_v42, %v525_v50 }
 0x2e0   :  { %v2478_v1 = vmul.f32 %v549_v48, %v541_v60  ;;  %v619_v63 = vadd.f32 %v611_v62, %v590_v35  ;;  %v589_v62 = vmul.f32 %v2392_v2, %v2506_v53  ;;  %v617_v35 = vadd.f32 %v609_v58, %v588_v51 }
 0x2e1   :  { %v613_v2 = vmul.f32 %v2398_v6, %v2359_v59 }
 0x2e2   :  { %v529_v33 = vpop.permute.xlu0 %528  ;;  %v527_v40 = vpop.permute.xlu1 %526  ;;  %v636_v9 = vmul.f32 %v2400_v7, %v2478_v1 }
 0x2e3   :  { %v539_v37 = vsel %vm536_vm2, %v525_v50, %v529_v33  ;;  %v542_v28 = vsel %vm536_vm2, %v523_v55, %v527_v40 }
 0x2e4   :  { %v2494_v38 = vmul.f32 %v553_v61, %v539_v37  ;;  %v2502_v60 = vmul.f32 %v549_v48, %v542_v28  ;;  %v644_v50 = vadd.f32 %v636_v9, %v615_v47  ;;  %v2508_v37 = vmul.f32 %v503_v10, %v486_v26 }
 0x2e5   :  { %v484_v10 = vsel %vm482_vm1, %v475_v36, %v479_v45  ;;  %v620_v45 = vadd.f32 %v612_v22, %v591_v14 }
 0x2e6   :  { %v533_v27 = vpop.permute.xlu0 %532  ;;  %v637_v39 = vmul.f32 %v2400_v7, %v2494_v38  ;;  %810 = vrot.lane.b32.xlu0 %v644_v50, %s2155_s30  ;;  %v531_v13 = vpop.permute.xlu1 %530  ;;  %v640_v25 = vmul.f32 %v2402_v16, %v2502_v60 }
 0x2e7   :  { %v537_v43 = vsel %vm536_vm2, %v529_v33, %v533_v27  ;;  %v543_v48 = vsel %vm536_vm2, %v533_v27, %v521_v42  ;;  %v540_v47 = vsel %vm536_vm2, %v527_v40, %v531_v13  ;;  %v610_v33 = vmul.f32 %v2396_v5, %v2357_v57 }
 0x2e8   :  { %v2521_v26 = vmul.f32 %v557_v34, %v537_v43  ;;  %v645_v9 = vadd.f32 %v637_v39, %v616_v3  ;;  %v2527_v28 = vmul.f32 %v561_v30, %v543_v48  ;;  %v2529_v27 = vmul.f32 %v553_v61, %v540_v47 }
 0x2e9   :  { %v648_v42 = vadd.f32 %v640_v25, %v619_v63  ;;  %v592_v40 = vmul.f32 %v2394_v4, %v2508_v37  ;;  %v2537_v3 = vmul.f32 %v507_v49, %v484_v10  ;;  %v744_v43 = vmul.f32 %v2404_v17, %v2445_v44 }
 0x2ea   :  { %v638_v36 = vmul.f32 %v2400_v7, %v2521_v26  ;;  %814 = vrot.lane.b32.xlu0 %v645_v9, %s2155_s30  ;;  %v535_v5 = vpop.permute.xlu1 %534  ;;  %v641_v39 = vmul.f32 %v2402_v16, %v2529_v27  ;;  %v639_v14 = vmul.f32 %v2400_v7, %v2527_v28  ;;  %v618_v48 = vadd.f32 %v610_v33, %v589_v62 }
 0x2eb   :  { %812 = vrot.lane.b32.xlu1 %v648_v42, %s2155_s30  ;;  %v538_v58 = vsel %vm536_vm2, %v531_v13, %v535_v5  ;;  %v544_v61 = vsel %vm536_vm2, %v535_v5, %v523_v55  ;;  %v593_v63 = vmul.f32 %v2394_v4, %v2537_v3  ;;  %v621_v55 = vadd.f32 %v613_v2, %v592_v40 }
 0x2ec   :  { %v646_v22 = vadd.f32 %v638_v36, %v617_v35  ;;  %v2549_v49 = vmul.f32 %v557_v34, %v538_v58  ;;  %v2551_v51 = vmul.f32 %v561_v30, %v544_v61  ;;  %v649_v50 = vadd.f32 %v641_v39, %v620_v45 }
 0x2ed   :  { %v614_v30 = vmul.f32 %v2398_v6, %v2363_v15  ;;  %v765_v7 = vmul.f32 %v2408_v19, %v2339_v46  ;;  %v766_v13 = vmul.f32 %v2408_v19, %v2344_v12  ;;  %v767_v4 = vmul.f32 %v2408_v19, %v2351_v54 }
 0x2ee   :  { %818 = vrot.lane.b32.xlu0 %v646_v22, %s2155_s30  ;;  %v642_v34 = vmul.f32 %v2402_v16, %v2549_v49  ;;  %v647_v25 = vadd.f32 %v639_v14, %v618_v48  ;;  %v794_v47 = vmul.f32 %v2412_v21, %v2478_v1  ;;  %v643_v9 = vmul.f32 %v2402_v16, %v2551_v51 }
 0x2ef   :  { %816 = vrot.lane.b32.xlu1 %v649_v50, %s2155_s30  ;;  %v768_v6 = vmul.f32 %v2408_v19, %v2357_v57  ;;  %v769_v33 = vmul.f32 %v2410_v20, %v2346_v52  ;;  %v770_v42 = vmul.f32 %v2410_v20, %v2353_v56  ;;  %v745_v62 = vmul.f32 %v2404_v17, %v2449_v8 }
 0x2f0   :  { %v650_v10 = vadd.f32 %v642_v34, %v621_v55  ;;  %v748_v35 = vmul.f32 %v2406_v18, %v2463_v11  ;;  %v773_v16 = vadd.f32 %v765_v7, %v744_v43  ;;  %v622_v36 = vadd.f32 %v614_v30, %v593_v63 }
 0x2f1   :  { %v746_v19 = vmul.f32 %v2404_v17, %v2476_v0  ;;  %v749_v45 = vmul.f32 %v2406_v18, %v2482_v24  ;;  %v747_v40 = vmul.f32 %v2404_v17, %v2506_v53  ;;  %v750_v5 = vmul.f32 %v2406_v18, %v2508_v37 }
 0x2f2   :  { %822 = vrot.lane.b32.xlu0 %v647_v25, %s2155_s30  ;;  %v802_v39 = vadd.f32 %v794_v47, %v773_v16  ;;  %v651_v2 = vadd.f32 %v643_v9, %v622_v36  ;;  %v795_v58 = vmul.f32 %v2412_v21, %v2494_v38  ;;  %v798_v61 = vmul.f32 %v2414_v23, %v2502_v60 }
 0x2f3   :  { %820 = vrot.lane.b32.xlu1 %v650_v10, %s2155_s30  ;;  %v771_v22 = vmul.f32 %v2410_v20, %v2359_v59  ;;  %v796_v50 = vmul.f32 %v2412_v21, %v2521_v26  ;;  %v799_v17 = vmul.f32 %v2414_v23, %v2529_v27  ;;  %v797_v14 = vmul.f32 %v2412_v21, %v2527_v28 }
 0x2f4   :  { %v774_v48 = vadd.f32 %v766_v13, %v745_v62  ;;  %v777_v63 = vadd.f32 %v769_v33, %v748_v35  ;;  %v800_v55 = vmul.f32 %v2414_v23, %v2549_v49  ;;  %v775_v34 = vadd.f32 %v767_v4, %v746_v19 }
 0x2f5   :  { %v778_v30 = vadd.f32 %v770_v42, %v749_v45  ;;  %v776_v7 = vadd.f32 %v768_v6, %v747_v40  ;;  %v772_v25 = vmul.f32 %v2410_v20, %v2363_v15  ;;  %v779_v21 = vadd.f32 %v771_v22, %v750_v5 }
 0x2f6   :  { %872 = vrot.lane.b32.xlu0 %v802_v39, %s2156_s12  ;;  %v803_v10 = vadd.f32 %v795_v58, %v774_v48  ;;  %v806_v47 = vadd.f32 %v798_v61, %v777_v63  ;;  %v751_v9 = vmul.f32 %v2406_v18, %v2537_v3  ;;  %v804_v16 = vadd.f32 %v796_v50, %v775_v34 }
 0x2f7   :  { %824 = vrot.lane.b32.xlu1 %v651_v2, %s2155_s30  ;;  %v658_v43 = vpop.permute.xlu0 %657  ;;  %v807_v36 = vadd.f32 %v799_v17, %v778_v30  ;;  %v805_v39 = vadd.f32 %v797_v14, %v776_v7  ;;  %v808_v6 = vadd.f32 %v800_v55, %v779_v21  ;;  %v801_v20 = vmul.f32 %v2414_v23, %v2551_v51 }
 0x2f8   :  { %v665_v13 = vmul.f32 %v658_v43, %v2445_v44  ;;  %v666_v44 = vmul.f32 %v658_v43, %v2449_v8  ;;  %v667_v19 = vmul.f32 %v658_v43, %v2476_v0  ;;  %v668_v45 = vmul.f32 %v658_v43, %v2506_v53 }
 0x2fa   :  { %876 = vrot.lane.b32.xlu0 %v803_v10, %s2156_s12 }
 0x2fb   :  { %874 = vrot.lane.b32.xlu1 %v806_v47, %s2156_s12  ;;  %v679_v4 = vpop.permute.xlu0 %678  ;;  %v663_v35 = vpop.permute.xlu1 %662 }
 0x2fc   :  { %v686_v33 = vmul.f32 %v679_v4, %v2339_v46  ;;  %v687_v42 = vmul.f32 %v679_v4, %v2344_v12  ;;  %v688_v18 = vmul.f32 %v679_v4, %v2351_v54  ;;  %v689_v62 = vmul.f32 %v679_v4, %v2357_v57 }
 0x2fd   :  { %v669_v40 = vmul.f32 %v663_v35, %v2463_v11  ;;  %v670_v23 = vmul.f32 %v663_v35, %v2482_v24  ;;  %v671_v46 = vmul.f32 %v663_v35, %v2508_v37  ;;  %v672_v12 = vmul.f32 %v663_v35, %v2537_v3 }
 0x2fe   :  { %v694_v5 = vadd.f32 %v686_v33, %v665_v13  ;;  %v695_v2 = vadd.f32 %v687_v42, %v666_v44  ;;  %v696_v54 = vadd.f32 %v688_v18, %v667_v19  ;;  %v697_v58 = vadd.f32 %v689_v62, %v668_v45  ;;  %880 = vrot.lane.b32.xlu0 %v804_v16, %s2156_s12  ;;  %v3023_v19 = vld [vmem:[#allocation3_spill] sm:$0xff] }
 0x2ff   :  { %878 = vrot.lane.b32.xlu1 %v807_v36, %s2156_s12  ;;  %v708_v57 = vpop.permute.xlu0 %707  ;;  %v684_v53 = vpop.permute.xlu1 %683 }
 0x300   :  { %v715_v8 = vmul.f32 %v708_v57, %v2478_v1  ;;  %v716_v0 = vmul.f32 %v708_v57, %v2494_v38  ;;  %v717_v11 = vmul.f32 %v708_v57, %v2521_v26  ;;  %v718_v24 = vmul.f32 %v708_v57, %v2527_v28 }
 0x301   :  { %v690_v37 = vmul.f32 %v684_v53, %v2346_v52  ;;  %v691_v3 = vmul.f32 %v684_v53, %v2353_v56  ;;  %v692_v61 = vmul.f32 %v684_v53, %v2359_v59  ;;  %v693_v22 = vmul.f32 %v684_v53, %v2363_v15 }
 0x302   :  { %v2641_v50 = vadd.f32 %v716_v0, %v695_v2  ;;  %v2643_v17 = vadd.f32 %v717_v11, %v696_v54  ;;  %v723_v1 = vadd.f32 %v715_v8, %v694_v5  ;;  %v2645_v14 = vadd.f32 %v718_v24, %v697_v58  ;;  %884 = vrot.lane.b32.xlu0 %v805_v39, %s2156_s12  ;;  %v1799_v39 = vld [vmem:[%s3009_s5 + $0xc] sm:$0xf] }
 0x303   :  { %v780_v38 = vadd.f32 %v772_v25, %v751_v9  ;;  %v698_v26 = vadd.f32 %v690_v37, %v669_v40  ;;  %v699_v28 = vadd.f32 %v691_v3, %v670_v23  ;;  %v700_v43 = vadd.f32 %v692_v61, %v671_v46  ;;  %882 = vrot.lane.b32.xlu1 %v808_v6, %s2156_s12  ;;  %v713_v56 = vpop.permute.xlu1 %712 }
 0x304   :  { %v701_v52 = vadd.f32 %v693_v22, %v672_v12  ;;  %v719_v59 = vmul.f32 %v713_v56, %v2502_v60  ;;  %v720_v15 = vmul.f32 %v713_v56, %v2529_v27  ;;  %v721_v48 = vmul.f32 %v713_v56, %v2549_v49 }
 0x305   :  { %v722_v63 = vmul.f32 %v713_v56, %v2551_v51  ;;  %v809_v55 = vadd.f32 %v801_v20, %v780_v38  ;;  %v1798_v51 = vld [vmem:[%s3009_s5 + $0x8] sm:$0xf]  ;;  %v901_v20 = vrot.slane %v1799_v39, %v2421_v31  ;;  %v905_v46 = vrot.slane %v1799_v39, %v2424_v32 }
 0x306   :  { %v2653_v34 = vadd.f32 %v720_v15, %v699_v28  ;;  %v2655_v30 = vadd.f32 %v721_v48, %v700_v43  ;;  %v727_v7 = vadd.f32 %v719_v59, %v698_v26  ;;  %v839_v13 = vrot.slane %v1798_v51, %v2421_v31  ;;  %v1113_v15 = vld [vmem:[%s3010_s9 + $0x80] sm:$0xff]  ;;  %v1114_v48 = vld [vmem:[%s3010_s9 + $0x88] sm:$0xff] }
 0x307   :  { %v2657_v25 = vadd.f32 %v722_v63, %v701_v52  ;;  %886 = vrot.lane.b32.xlu1 %v809_v55, %s2156_s12  ;;  %v843_v44 = vrot.slane %v1798_v51, %v2424_v32  ;;  %v847_v45 = vrot.slane %v1798_v51, %v3023_v19  ;;  %v851_v40 = vrot.slane %v1798_v51, %v2440_v41 }
 0x308   :  { %v909_v3 = vrot.slane %v1799_v39, %v3023_v19  ;;  %v1116_v19 = vld [vmem:[%s3010_s9 + $0x98] sm:$0xff] }
 0x358   :  { %v811_v10 = vpop.permute.xlu0 %810 }
 0x35c   :  { %v815_v47 = vpop.permute.xlu0 %814 }
 0x35d   :  { %v813_v21 = vpop.permute.xlu1 %812  ;;  %v831_v5 = vsel %vm826_vm3, %v811_v10, %v815_v47 }
 0x35e   :  { %v857_v53 = vmul.f32 %v843_v44, %v831_v5 }
 0x360   :  { %v819_v60 = vpop.permute.xlu0 %818 }
 0x361   :  { %v817_v9 = vpop.permute.xlu1 %816  ;;  %v829_v54 = vsel %vm826_vm3, %v815_v47, %v819_v60 }
 0x362   :  { %v832_v23 = vsel %vm826_vm3, %v813_v21, %v817_v9  ;;  %v858_v61 = vmul.f32 %v847_v45, %v829_v54 }
 0x363   :  { %v861_v37 = vmul.f32 %v843_v44, %v832_v23  ;;  %v1115_v44 = vld [vmem:[%s3010_s9 + $0x90] sm:$0xff] }
 0x364   :  { %v823_v27 = vpop.permute.xlu0 %822  ;;  %v2055_v54 = vpack.c.bf16 %v1116_v19, %v1115_v44  ;;  %v1125_v44 = vld [vmem:[%s3010_s9 + $0xe0] sm:$0xff]  ;;  %v1126_v19 = vld [vmem:[%s3010_s9 + $0xe8] sm:$0xff] }
 0x365   :  { %v821_v16 = vpop.permute.xlu1 %820  ;;  %v833_v4 = vsel %vm826_vm3, %v823_v27, %v811_v10  ;;  %v827_v58 = vsel %vm826_vm3, %v819_v60, %v823_v27  ;;  %v869_v47 = vadd.f32 %v861_v37, %v2653_v34  ;;  %v2051_v27 = vpack.c.bf16 %v1114_v48, %v1113_v15 }
 0x366   :  { %v856_v62 = vmul.f32 %v839_v13, %v833_v4  ;;  %v830_v57 = vsel %vm826_vm3, %v817_v9, %v821_v16  ;;  %v859_v43 = vmul.f32 %v851_v40, %v827_v58  ;;  %v866_v9 = vadd.f32 %v858_v61, %v2643_v17  ;;  %v1148_v58 = vld [vmem:[%s3010_s9 + $0x198] sm:$0xff]  ;;  %v1131_v61 = vld [vmem:[%s3010_s9 + $0x110] sm:$0xff] }
 0x367   :  { %v862_v52 = vmul.f32 %v847_v45, %v830_v57  ;;  %v934_v45 = vld [vmem:[%s3011_s6] sm:$0xff]  ;;  %v1099_v57 = vld [vmem:[%s3010_s9 + $0x10] sm:$0xff] }
 0x368   :  { %v873_v49 = vpop.permute.xlu0 %872  ;;  %v864_v0 = vadd.f32 %v856_v62, %v723_v1  ;;  %v913_v1 = vrot.slane %v1799_v39, %v2440_v41  ;;  %v865_v41 = vadd.f32 %v857_v53, %v2641_v50  ;;  %v867_v4 = vadd.f32 %v859_v43, %v2645_v14  ;;  %v1146_v14 = vld [vmem:[%s3010_s9 + $0x188] sm:$0xff]  ;;  %v1101_v43 = vld [vmem:[%s3010_s9 + $0x20] sm:$0xff] }
 0x369   :  { %v825_v36 = vpop.permute.xlu1 %824 }
 0x36a   :  { %v834_v6 = vsel %vm826_vm3, %v825_v36, %v813_v21  ;;  %v828_v22 = vsel %vm826_vm3, %v821_v16, %v825_v36 }
 0x36b   :  { %v860_v35 = vmul.f32 %v839_v13, %v834_v6  ;;  %v863_v21 = vmul.f32 %v851_v40, %v828_v22  ;;  %v1132_v22 = vld [vmem:[%s3010_s9 + $0x118] sm:$0xff] }
 0x36c   :  { %v877_v33 = vpop.permute.xlu0 %876 }
 0x36d   :  { %v875_v42 = vpop.permute.xlu1 %874  ;;  %v893_v18 = vsel %vm888_vm4, %v873_v49, %v877_v33  ;;  %v868_v11 = vadd.f32 %v860_v35, %v727_v7  ;;  %v871_v34 = vadd.f32 %v863_v21, %v2657_v25  ;;  %v1104_v21 = vld [vmem:[%s3010_s9 + $0x38] sm:$0xff] }
 0x36e   :  { %v918_v31 = vmul.f32 %v901_v20, %v893_v18  ;;  %v1145_v18 = vld [vmem:[%s3010_s9 + $0x180] sm:$0xff] }
 0x36f   :  { %v2083_v23 = vpack.c.bf16 %v1146_v14, %v1145_v18  ;;  %v1137_v14 = vld [vmem:[%s3010_s9 + $0x140] sm:$0xff] }
 0x370   :  { %v881_v12 = vpop.permute.xlu0 %880  ;;  %v926_v38 = vadd.f32 %v918_v31, %v864_v0  ;;  %v1117_v0 = vld [vmem:[%s3010_s9 + $0xa0] sm:$0xff] }
 0x371   :  { %v879_v2 = vpop.permute.xlu1 %878  ;;  %v891_v24 = vsel %vm888_vm4, %v877_v33, %v881_v12 }
 0x372   :  { %v894_v8 = vsel %vm888_vm4, %v875_v42, %v879_v2  ;;  %v919_v56 = vmul.f32 %v905_v46, %v891_v24  ;;  %v3024_v24 = vmov 0.0  }
 0x373   :  { %v922_v32 = vmul.f32 %v901_v20, %v894_v8  ;;  %v1100_v8 = vld [vmem:[%s3010_s9 + $0x18] sm:$0xff] }
 0x374   :  { %v885_v28 = vpop.permute.xlu0 %884  ;;  %v927_v16 = vadd.f32 %v919_v56, %v865_v41  ;;  %v1119_v56 = vld [vmem:[%s3010_s9 + $0xb0] sm:$0xff]  ;;  %v1152_v41 = vld [vmem:[%s3010_s9 + $0x1b8] sm:$0xff] }
 0x375   :  { %v930_v26 = vadd.f32 %v922_v32, %v868_v11  ;;  %v883_v59 = vpop.permute.xlu1 %882  ;;  %v889_v55 = vsel %vm888_vm4, %v881_v12, %v885_v28  ;;  %v895_v7 = vsel %vm888_vm4, %v885_v28, %v873_v49  ;;  %v870_v49 = vadd.f32 %v862_v52, %v2655_v30  ;;  %v1097_v30 = vld [vmem:[%s3010_s9] sm:$0xff]  ;;  %v1130_v12 = vld [vmem:[%s3010_s9 + $0x108] sm:$0xff] }
 0x376   :  { %v892_v10 = vsel %vm888_vm4, %v879_v2, %v883_v59  ;;  %v920_v36 = vmul.f32 %v909_v3, %v889_v55  ;;  %v921_v51 = vmul.f32 %v913_v1, %v895_v7  ;;  %v2053_v31 = vpack.c.bf16 %v1098_v29, %v1097_v30  ;;  %v1147_v2 = vld [vmem:[%s3010_s9 + $0x190] sm:$0xff]  ;;  %v1118_v11 = vld [vmem:[%s3010_s9 + $0xa8] sm:$0xff] }
 0x377   :  { %v2045_v63 = vpack.c.bf16 %v930_v26, %v926_v38  ;;  %v923_v60 = vmul.f32 %v905_v46, %v892_v10  ;;  %v1129_v46 = vld [vmem:[%s3010_s9 + $0x100] sm:$0xff]  ;;  %v935_v32 = vld [vmem:[%s3011_s6 + $0x8] sm:$0xff]  ;;  %v2087_v37 = vpack.c.bf16 %v1148_v58, %v1147_v2  ;;  %v2059_v26 = vpack.c.bf16 %v1118_v11, %v1117_v0  ;;  %v1151_v7 = vld [vmem:[%s3010_s9 + $0x1b0] sm:$0xff] }
 0x378   :  { %v928_v25 = vadd.f32 %v920_v36, %v866_v9  ;;  %v2085_v53 = vpack.c.bf16 %v1130_v12, %v1129_v46  ;;  %v1149_v38 = vld [vmem:[%s3010_s9 + $0x1a0] sm:$0xff]  ;;  %v1150_v28 = vld [vmem:[%s3010_s9 + $0x1a8] sm:$0xff]  ;;  %v1155_v29 = vld [vmem:[%s3010_s9 + $0x1d0] sm:$0xff]  ;;  %v2075_v12 = vpack.c.bf16 %v1126_v19, %v1125_v44 }
 0x379   :  { %v931_v39 = vadd.f32 %v923_v60, %v869_v47  ;;  %v887_v13 = vpop.permute.xlu1 %886  ;;  %v1102_v52 = vld [vmem:[%s3010_s9 + $0x28] sm:$0xff]  ;;  %v2091_v15 = vpack.c.bf16 %v1150_v28, %v1149_v38  ;;  %v1103_v47 = vld [vmem:[%s3010_s9 + $0x30] sm:$0xff]  ;;  %v1121_v60 = vld [vmem:[%s3010_s9 + $0xc0] sm:$0xff] }
 0x37a   :  { %v890_v6 = vsel %vm888_vm4, %v883_v59, %v887_v13  ;;  %v896_v50 = vsel %vm888_vm4, %v887_v13, %v875_v42  ;;  %v929_v42 = vadd.f32 %v921_v51, %v867_v4  ;;  %v2089_v59 = vpack.c.bf16 %v1132_v22, %v1131_v61  ;;  %v1134_v55 = vld [vmem:[%s3010_s9 + $0x128] sm:$0xff]  ;;  %v1135_v51 = vld [vmem:[%s3010_s9 + $0x130] sm:$0xff]  ;;  %v1153_v13 = vld [vmem:[%s3010_s9 + $0x1c0] sm:$0xff] }
 0x37b   :  { %v924_v20 = vmul.f32 %v909_v3, %v890_v6  ;;  %v925_v17 = vmul.f32 %v913_v1, %v896_v50  ;;  %v2043_v33 = vpack.c.bf16 %v931_v39, %v927_v16  ;;  %v2057_v3 = vpack.c.bf16 %v1100_v8, %v1099_v57  ;;  %v1120_v1 = vld [vmem:[%s3010_s9 + $0xb8] sm:$0xff]  ;;  %v1122_v9 = vld [vmem:[%s3010_s9 + $0xc8] sm:$0xff]  ;;  %v1105_v6 = vld [vmem:[%s3010_s9 + $0x40] sm:$0xff] }
 0x37c   :  { %v2061_v48 = vpack.c.bf16 %v1102_v52, %v1101_v43  ;;  %v2063_v10 = vpack.c.bf16 %v1120_v1, %v1119_v56  ;;  %v2095_v16 = vpack.c.bf16 %v1152_v41, %v1151_v7  ;;  %v2065_v36 = vpack.c.bf16 %v1104_v21, %v1103_v47  ;;  %v1136_v39 = vld [vmem:[%s3010_s9 + $0x138] sm:$0xff]  ;;  %v1106_v50 = vld [vmem:[%s3010_s9 + $0x48] sm:$0xff]  ;;  %v1157_v46 = vld [vmem:[%s3010_s9 + $0x1e0] sm:$0xff] }
 0x37d   :  { %v932_v62 = vadd.f32 %v924_v20, %v870_v49  ;;  %v933_v35 = vadd.f32 %v925_v17, %v871_v34  ;;  %2044 = vmatprep.subr.bf16.mxu0 %v2043_v33  ;;  %v2067_v4 = vpack.c.bf16 %v1122_v9, %v1121_v60  ;;  %v1154_v49 = vld [vmem:[%s3010_s9 + $0x1c8] sm:$0xff]  ;;  %v1123_v34 = vld [vmem:[%s3010_s9 + $0xd0] sm:$0xff]  ;;  %v1124_v20 = vld [vmem:[%s3010_s9 + $0xd8] sm:$0xff]  ;;  %v2097_v17 = vpack.c.bf16 %v1136_v39, %v1135_v51 }
 0x37e   :  { %2046 = vmatpush1.bf16.msra.mxu0 %v2045_v63  ;;  %v1133_v63 = vld [vmem:[%s3010_s9 + $0x120] sm:$0xff]  ;;  %v2099_v33 = vpack.c.bf16 %v1154_v49, %v1153_v13  ;;  %v2069_v18 = vpack.c.bf16 %v1106_v50, %v1105_v6  ;;  %v1138_v30 = vld [vmem:[%s3010_s9 + $0x148] sm:$0xff]  ;;  %v1127_v57 = vld [vmem:[%s3010_s9 + $0xf0] sm:$0xff] }
 0x37f   :  { %v2049_v40 = vpack.c.bf16 %v932_v62, %v928_v25  ;;  %v2047_v5 = vpack.c.bf16 %v933_v35, %v929_v42  ;;  %2052 = vmatprep.subr.bf16.mxu0 %v2051_v27  ;;  %v2093_v27 = vpack.c.bf16 %v1134_v55, %v1133_v63  ;;  %v2071_v25 = vpack.c.bf16 %v1124_v20, %v1123_v34  ;;  %v1156_v42 = vld [vmem:[%s3010_s9 + $0x1d8] sm:$0xff]  ;;  %v1107_v62 = vld [vmem:[%s3010_s9 + $0x50] sm:$0xff]  ;;  %v1158_v2 = vld [vmem:[%s3010_s9 + $0x1e8] sm:$0xff] }
 0x380   :  { %v1108_v35 = vld [vmem:[%s3010_s9 + $0x58] sm:$0xff]  ;;  %v1110_v58 = vld [vmem:[%s3010_s9 + $0x68] sm:$0xff]  ;;  %v2107_v11 = vpack.c.bf16 %v1158_v2, %v1157_v46  ;;  %v1159_v61 = vld [vmem:[%s3010_s9 + $0x1f0] sm:$0xff] }
 0x381   :  { %2048 = vmatprep.subr.bf16.mxu1 %v2047_v5  ;;  %1816 = vmatmul.mubr.msk.f32.vlgmr.msra.gmra.mrb[12].mxu0 %vm936_vm5, %v934_v45  ;;  %v2073_v5 = vpack.c.bf16 %v1108_v35, %v1107_v62  ;;  %v1128_v8 = vld [vmem:[%s3010_s9 + $0xf8] sm:$0xff]  ;;  %v1111_v28 = vld [vmem:[%s3010_s9 + $0x70] sm:$0xff]  ;;  %v1311_v21 = vld [vmem:[%s3012_s7] sm:$0xff] }
 0x382   :  { %2050 = vmatpush1.bf16.msra.mxu1 %v2049_v40  ;;  %1013 = vmatprep.mubr.f32.mxu0 %v3024_v24  ;;  %v2103_v40 = vpack.c.bf16 %v1156_v42, %v1155_v29  ;;  %v1160_v22 = vld [vmem:[%s3010_s9 + $0x1f8] sm:$0xff]  ;;  %v1143_v56 = vld [vmem:[%s3010_s9 + $0x170] sm:$0xff]  ;;  %v3025_v42 = vld [vmem:[#allocation2_spill] sm:$0xff] }
 0x383   :  { %2084 = vmatprep.subr.bf16.mxu1 %v2083_v23  ;;  %2054 = vmatpush3.bf16.msra.mxu0 %v2053_v31  ;;  %v1139_v23 = vld [vmem:[%s3010_s9 + $0x150] sm:$0xff]  ;;  %v1140_v31 = vld [vmem:[%s3010_s9 + $0x158] sm:$0xff] }
 0x384   :  { %2056 = vmatprep.subr.bf16.mxu0 %v2055_v54  ;;  %v1109_v54 = vld [vmem:[%s3010_s9 + $0x60] sm:$0xff]  ;;  %v2105_v0 = vpack.c.bf16 %v1140_v31, %v1139_v23  ;;  %v1112_v43 = vld [vmem:[%s3010_s9 + $0x78] sm:$0xff] }
 0x385   :  { %1818 = vmatmul.mubr.msk.f32.vlgmr.msra.gmra.mrb[12].mxu1 %vm936_vm5, %v934_v45  ;;  %1817 = vmatmul.mubr.msk.f32.gmra.mrb[14].mxu0 %vm936_vm5, %v935_v32  ;;  %v2101_v45 = vpack.c.bf16 %v1138_v30, %v1137_v14  ;;  %v2081_v52 = vpack.c.bf16 %v1112_v43, %v1111_v28  ;;  %v1144_v1 = vld [vmem:[%s3010_s9 + $0x178] sm:$0xff]  ;;  %v1406_v30 = vld [vmem:[%s3013_s10] sm:$0xff] }
 0x386   :  { %1090 = vmatprep.mubr.f32.mxu1 %v3024_v24  ;;  %2086 = vmatpush3.bf16.msra.mxu1 %v2085_v53  ;;  %v1141_v53 = vld [vmem:[%s3010_s9 + $0x160] sm:$0xff] }
 0x387   :  { %2088 = vmatprep.subr.bf16.mxu1 %v2087_v37  ;;  %2058 = vmatpush3.bf16.msra.mxu0 %v2057_v3  ;;  %v1142_v37 = vld [vmem:[%s3010_s9 + $0x168] sm:$0xff]  ;;  %v2079_v3 = vpack.c.bf16 %v1128_v8, %v1127_v57 }
 0x388   :  { %2060 = vmatprep.subr.bf16.mxu0 %v2059_v26  ;;  %v2109_v38 = vpack.c.bf16 %v1142_v37, %v1141_v53  ;;  %v2111_v26 = vpack.c.bf16 %v1160_v22, %v1159_v61 }
 0x389   :  { %1819 = vmatmul.mubr.msk.f32.gmra.mrb[14].mxu1 %vm936_vm5, %v935_v32  ;;  %v2077_v32 = vpack.c.bf16 %v1110_v58, %v1109_v54 }
 0x38a   :  { %2090 = vmatpush3.bf16.msra.mxu1 %v2089_v59  ;;  %v2113_v59 = vpack.c.bf16 %v1144_v1, %v1143_v56 }
 0x38b   :  { %2092 = vmatprep.subr.bf16.mxu1 %v2091_v15  ;;  %2062 = vmatpush3.bf16.msra.mxu0 %v2061_v48 }
 0x38c   :  { %2064 = vmatprep.subr.bf16.mxu0 %v2063_v10 }
 0x38e   :  { %2094 = vmatpush3.bf16.msra.mxu1 %v2093_v27 }
 0x38f   :  { %2096 = vmatprep.subr.bf16.mxu1 %v2095_v16  ;;  %2066 = vmatpush3.bf16.msra.mxu0 %v2065_v36 }
 0x390   :  { %2068 = vmatprep.subr.bf16.mxu0 %v2067_v4 }
 0x392   :  { %2098 = vmatpush3.bf16.msra.mxu1 %v2097_v17 }
 0x393   :  { %2100 = vmatprep.subr.bf16.mxu1 %v2099_v33  ;;  %2070 = vmatpush3.bf16.msra.mxu0 %v2069_v18  ;;  %v1312_v33 = vld [vmem:[%s3012_s7 + $0x8] sm:$0xff]  ;;  %v2157_v18 = vmov 1983009808  }
 0x394   :  { %2072 = vmatprep.subr.bf16.mxu0 %v2071_v25  ;;  %v1410_v14 = vunpack.c.l.s4 %v2157_v18  ;;  %v1408_v25 = vcombine.high %v1406_v30, %v1406_v30 }
 0x396   :  { %2102 = vmatpush3.bf16.msra.mxu1 %v2101_v45  ;;  %v1411_v29 = vunpack.c.0.s8 %v1410_v14 }
 0x397   :  { %2104 = vmatprep.subr.bf16.mxu1 %v2103_v40  ;;  %2074 = vmatpush3.bf16.msra.mxu0 %v2073_v5 }
 0x398   :  { %2076 = vmatprep.subr.bf16.mxu0 %v2075_v12  ;;  %v1414_v62 = vsub.s32 %v1411_v29, %v3025_v42 }
 0x39a   :  { %2106 = vmatpush3.bf16.msra.mxu1 %v2105_v0  ;;  %v1415_v35 = vrot.slane %v1406_v30, %v1414_v62  ;;  %v1422_v44 = vrot.slane %v1408_v25, %v1414_v62 }
 0x39b   :  { %2108 = vmatprep.subr.bf16.mxu1 %v2107_v11  ;;  %2078 = vmatpush3.bf16.msra.mxu0 %v2077_v32 }
 0x39c   :  { %2080 = vmatprep.subr.bf16.mxu0 %v2079_v3  ;;  %v1423_v19 = vcombine.high %v1415_v35, %v1415_v35  ;;  %v1424_v45 = vcombine.high %v1422_v44, %v1422_v44 }
 0x39e   :  { %2110 = vmatpush3.bf16.msra.mxu1 %v2109_v38 }
 0x39f   :  { %2112 = vmatprep.subr.bf16.mxu1 %v2111_v26  ;;  %2082 = vmatpush3.bf16.msra.mxu0 %v2081_v52 }
 0x3a2   :  { %2114 = vmatpush3.bf16.msra.mxu1 %v2113_v59 }
 0x3a3   :  { %1824 = vmatprep.subr.msk.mxu1 %vm1432_vm6, %v1423_v19 }
 0x454   :  { %v2918_v15 = vpop.f32.mrb[12].mxu0 }
 0x455   :  { %v2920_v48 = vpop.f32.mrb[13].mxu0 }
 0x456   :  { %1225 = vmatprep.mubr.f32.mxu0 %v2920_v48 }
 0x457   :  { %1226 = vmatmul.mubr.f32.vlgmr.msra.gmra.mrb[16].mxu0 %v2918_v15 }
 0x458   :  { %v2924_v63 = vpop.f32.mrb[12].mxu1  ;;  %v2926_v55 = vpop.f32.mrb[14].mxu0 }
 0x459   :  { %v2928_v7 = vpop.f32.mrb[13].mxu1  ;;  %v2930_v10 = vpop.f32.mrb[15].mxu0 }
 0x45a   :  { %1300 = vmatprep.mubr.f32.mxu1 %v2928_v7  ;;  %1230 = vmatprep.mubr.f32.mxu0 %v2930_v10 }
 0x45b   :  { %1301 = vmatmul.mubr.f32.vlgmr.msra.gmra.mrb[16].mxu1 %v2924_v63  ;;  %1231 = vmatmul.mubr.f32.gmra.mrb[18].mxu0 %v2926_v55 }
 0x45c   :  { %v2936_v41 = vpop.f32.mrb[14].mxu1  ;;  %2008 = vmatprep.mubr.msk.f32.mxu0 %vm936_vm5, %v1311_v21  ;;  %1825 = vmatpush1.msk.msra.mxu1 %vm1432_vm6, %v1415_v35 }
 0x45d   :  { %v2938_v47 = vpop.f32.mrb[15].mxu1 }
 0x45e   :  { %1305 = vmatprep.mubr.f32.mxu1 %v2938_v47 }
 0x45f   :  { %1306 = vmatmul.mubr.f32.gmra.mrb[18].mxu1 %v2936_v41 }
 0x460   :  { %1505 = vmatprep.mubr.f32.mxu1 %v3024_v24 }
 0x52a   :  { %v1956_v60 = vpop.f32.mrb[16].mxu0 }
 0x52b   :  { %v1957_v9 = vpop.f32.mrb[17].mxu0 }
 0x52c   :  { %v1958_v27 = vadd.f32 %v1957_v9, %v1956_v60 }
 0x52e   :  { %v1994_v16 = vpop.f32.mrb[16].mxu1  ;;  %v1959_v36 = vpop.f32.mrb[18].mxu0 }
 0x52f   :  { %v1995_v51 = vpop.f32.mrb[17].mxu1  ;;  %v1960_v39 = vpop.f32.mrb[19].mxu0 }
 0x530   :  { %v1996_v13 = vadd.f32 %v1995_v51, %v1994_v16  ;;  %v1961_v4 = vadd.f32 %v1960_v39, %v1959_v36 }
 0x532   :  { %v1303_v49 = vadd.f32 %v1996_v13, %v1958_v27  ;;  %v1997_v6 = vpop.f32.mrb[18].mxu1 }
 0x533   :  { %v1998_v50 = vpop.f32.mrb[19].mxu1 }
 0x534   :  { %v1999_v34 = vadd.f32 %v1998_v50, %v1997_v6 }
 0x536   :  { %v1308_v20 = vadd.f32 %v1999_v34, %v1961_v4 }
 0x538   :  { %v2115_v17 = vpack.c.bf16 %v1308_v20, %v1303_v49 }
 0x53a   :  { %2116 = vmatprep.subr.bf16.mxu0 %v2115_v17 }
 0x53b   :  { %2118 = vmatpush3.bf16.msra.mxu0 %v2115_v17 }
 0x53c   :  { %1828 = vmatprep.subr.msk.mxu0 %vm1432_vm6, %v1424_v45 }
 0x53e   :  { %2009 = vmatmul.mubr.msk.f32.vlgmr.msra.gmra.mrb[20].mxu0 %vm936_vm5, %v1312_v33 }
 0x53f   :  { %1582 = vmatprep.mubr.f32.mxu0 %v3024_v24  ;;  %1829 = vmatpush1.msk.msra.mxu0 %vm1432_vm6, %v1422_v44 }
 0x611   :  { %v2010_v40 = vpop.f32.mrb[20].mxu0 }
 0x612   :  { %v1823_v5 = vmul.f32 -1.442695, %v2010_v40  ;;  %v1385_v23 = vpop.f32.mrb[21].mxu0 }
 0x613   :  { %v1822_v31 = vmul.f32 -1.442695, %v1385_v23 }
 0x614   :  { %2142 = vpow2.f32 %v1823_v5 }
 0x615   :  { %2144 = vpow2.f32 %v1822_v31 }
 0x61e   :  { %v2143_v46 = vpop.eup %2142 }
 0x61f   :  { %v2145_v12 = vpop.eup %2144  ;;  %v1401_v54 = vadd.f32 1.0, %v2143_v46 }
 0x620   :  { %v1400_v2 = vadd.f32 1.0, %v2145_v12 }
 0x622   :  { %2146 = vrcp.f32 %v1400_v2 }
 0x623   :  { %2148 = vrcp.f32 %v1401_v54 }
 0x62c   :  { %v2147_v58 = vpop.eup %2146 }
 0x62d   :  { %1826 = vmatmul.mubr.msk.f32.vlgmr.msra.gmra.mrb[20].mxu1 %vm1425_vm7, %v2147_v58  ;;  %1830 = vmatmul.mubr.msk.f32.vlgmr.msra.gmra.mrb[22].mxu0 %vm1425_vm7, %v2147_v58  ;;  %v2149_v57 = vpop.eup %2148 }
 0x62e   :  { %1511 = vmatprep.mubr.f32.mxu1 %v3024_v24  ;;  %1588 = vmatprep.mubr.f32.mxu0 %v3024_v24 }
 0x631   :  { %1827 = vmatmul.mubr.msk.f32.gmra.mrb[22].mxu1 %vm1425_vm7, %v2149_v57  ;;  %1831 = vmatmul.mubr.msk.f32.gmra.mrb[24].mxu0 %vm1425_vm7, %v2149_v57 }
 0x632   :  { %1691 = vmatprep.mubr.f32.mxu1 %v3024_v24  ;;  %1768 = vmatprep.mubr.f32.mxu0 %v3024_v24 }
 0x700   :  { %v1507_v8 = vpop.f32.mrb[20].mxu1  ;;  %v1584_v0 = vpop.f32.mrb[22].mxu0 }
 0x701   :  { %v1595_v11 = vmul.f32 %v1507_v8, %v2918_v15  ;;  %v1597_v32 = vmul.f32 %v1584_v0, %v2924_v63  ;;  %v1509_v53 = vpop.f32.mrb[21].mxu1  ;;  %v1586_v37 = vpop.f32.mrb[23].mxu0 }
 0x702   :  { %v1596_v3 = vmul.f32 %v1509_v53, %v2920_v48  ;;  %v1598_v61 = vmul.f32 %v1586_v37, %v2928_v7 }
 0x703   :  { %v1603_v26 = vmax.f32 %v1595_v11, 0.0  ;;  %v1605_v28 = vmax.f32 %v1597_v32, 0.0 }
 0x704   :  { %v1513_v22 = vpop.f32.mrb[22].mxu1  ;;  %v1590_v38 = vpop.f32.mrb[24].mxu0  ;;  %v1604_v59 = vmax.f32 %v1596_v3, 0.0  ;;  %v1606_v15 = vmax.f32 %v1598_v61, 0.0 }
 0x705   :  { %v1599_v43 = vmul.f32 %v1513_v22, %v2926_v55  ;;  %v1601_v52 = vmul.f32 %v1590_v38, %v2936_v41  ;;  %v1515_v56 = vpop.f32.mrb[23].mxu1  ;;  %v1592_v1 = vpop.f32.mrb[25].mxu0  ;;  %v1611_v27 = vmin.f32 %v1603_v26, 6.0  ;;  %v1613_v16 = vmin.f32 %v1605_v28, 6.0 }
 0x706   :  { %v1600_v63 = vmul.f32 %v1515_v56, %v2930_v10  ;;  %v1602_v21 = vmul.f32 %v1592_v1, %v2938_v47  ;;  %v1612_v39 = vmin.f32 %v1604_v59, 6.0  ;;  %v1614_v55 = vmin.f32 %v1606_v15, 6.0  ;;  %v1619_v10 = vld [vmem:[%s3014_s8] sm:$0xff]  ;;  %v1620_v47 = vld [vmem:[%s3014_s8 + $0x8] sm:$0xff] }
 0x707   :  { %v1607_v60 = vmax.f32 %v1599_v43, 0.0  ;;  %v1609_v48 = vmax.f32 %v1601_v52, 0.0 }
 0x708   :  { %v1608_v9 = vmax.f32 %v1600_v63, 0.0  ;;  %v1610_v7 = vmax.f32 %v1602_v21, 0.0 }
 0x709   :  { %v1615_v36 = vmin.f32 %v1607_v60, 6.0  ;;  %v1617_v51 = vmin.f32 %v1609_v48, 6.0 }
 0x70a   :  { %v1616_v13 = vmin.f32 %v1608_v9, 6.0  ;;  %v1618_v41 = vmin.f32 %v1610_v7, 6.0 }
 0x70b   :  { %v2121_v4 = vpack.c.bf16 %v1615_v36, %v1611_v27  ;;  %v2125_v49 = vpack.c.bf16 %v1617_v51, %v1613_v16 }
 0x70c   :  { %v2119_v6 = vpack.c.bf16 %v1616_v13, %v1612_v39  ;;  %v2123_v50 = vpack.c.bf16 %v1618_v41, %v1614_v55 }
 0x70e   :  { %2120 = vmatprep.subr.bf16.mxu1 %v2119_v6  ;;  %2124 = vmatprep.subr.bf16.mxu0 %v2123_v50 }
 0x70f   :  { %2122 = vmatpush1.bf16.msra.mxu1 %v2121_v4  ;;  %2126 = vmatpush1.bf16.msra.mxu0 %v2125_v49 }
 0x712   :  { %1832 = vmatmul.mubr.msk.f32.vlgmr.msra.gmra.mrb[24].mxu1 %vm936_vm5, %v1619_v10  ;;  %1834 = vmatmul.mubr.msk.f32.vlgmr.msra.gmra.mrb[26].mxu0 %vm936_vm5, %v1619_v10 }
 0x713   :  { %1697 = vmatprep.mubr.f32.mxu1 %v3024_v24  ;;  %1774 = vmatprep.mubr.f32.mxu0 %v3024_v24 }
 0x716   :  { %1833 = vmatmul.mubr.msk.f32.gmra.mrb[26].mxu1 %vm936_vm5, %v1620_v47  ;;  %1835 = vmatmul.mubr.msk.f32.gmra.mrb[28].mxu0 %vm936_vm5, %v1620_v47 }
 0x7e5   :  { %v1693_v34 = vpop.f32.mrb[24].mxu1  ;;  %v1770_v20 = vpop.f32.mrb[26].mxu0 }
 0x7e6   :  { %1781 = vst [vmem:[%s3015_s11] sm:$0xff] %v1693_v34  ;;  %1783 = vst [vmem:[%s3015_s11 + $0x10] sm:$0xff] %v1770_v20  ;;  %v1695_v17 = vpop.f32.mrb[25].mxu1  ;;  %v1772_v24 = vpop.f32.mrb[27].mxu0 }
 0x7e7   :  { %1782 = vst [vmem:[%s3015_s11 + $0x8] sm:$0xff] %v1695_v17  ;;  %1784 = vst [vmem:[%s3015_s11 + $0x18] sm:$0xff] %v1772_v24 }
 0x7e9   :  { %v1699_v33 = vpop.f32.mrb[26].mxu1  ;;  %v1776_v18 = vpop.f32.mrb[28].mxu0 }
 0x7ea   :  { %1785 = vst [vmem:[%s3015_s11 + $0x20] sm:$0xff] %v1699_v33  ;;  %1787 = vst [vmem:[%s3015_s11 + $0x30] sm:$0xff] %v1776_v18  ;;  %v1701_v14 = vpop.f32.mrb[27].mxu1  ;;  %v1778_v30 = vpop.f32.mrb[29].mxu0 }
 0x7eb   :  { %1786 = vst [vmem:[%s3015_s11 + $0x28] sm:$0xff] %v1701_v14  ;;  %1788 = vst [vmem:[%s3015_s11 + $0x38] sm:$0xff] %v1778_v30 }

</bundles_post_ra>
